<compile_context>
chip_gen: v7x
topology: tpu7x:2x2x1
jax: 0.10.0
libtpu: 0.0.40
codegen_flags: <defaults>
</compile_context>

<pallas_src>
import functools
import math

import jax
import jax.numpy as jnp
from jax import lax
from jax.experimental import pallas as pl
from jax.experimental.pallas import tpu as pltpu


ELBO_LANES = 128  # lane-dense output row width


def _mod_const(i, m):
    """i % m for int32 iota arrays; power-of-two m uses bitwise AND."""
    if (m & (m - 1)) == 0:
        return jnp.bitwise_and(i, m - 1)
    return i % m  # TODO(synk): non-power-of-two z_dim relies on vector rem lowering.


# ----------------------------------------------------------------------------
# Fused forward kernel (one batch element per grid step)
# ----------------------------------------------------------------------------
def _dvae_fused_kernel(
    patches_ref,   # (1, C*KH*KW, OH*OW)   bf16  im2col patches, K on sublanes
    x_ref,         # (1, 1, C*H*W)         f32   flattened input image
    u_ref,         # (1, nd, zd)           f32   uniform noise for gumbel
    conv_w_ref,    # (conv_f, C*KH*KW)     bf16
    conv_b_ref,    # (conv_f, 1)           f32
    enc_w_ref,     # (conv_f, OH*OW, nd*zd) bf16 (channel-major == NCHW flatten)
    enc_b_ref,     # (1, nd*zd)            f32
    dec_w_ref,     # (nd*zd, h_dim)        bf16
    dec_b_ref,     # (1, h_dim)            f32
    prob_w_ref,    # (h_dim, C*H*W)        bf16
    prob_b_ref,    # (1, C*H*W)            f32
    elbo_ref,      # (1, 1, ELBO_LANES)    f32   elbo broadcast over lanes
    *, temp, z_dim, num_dists,
):
    f32 = jnp.float32
    bf16 = jnp.bfloat16
    nd, zd = num_dists, z_dim
    nz = nd * zd

    # ---- encoder: Conv2d(3x3, s=2, p=1) as one MXU matmul over im2col taps ---
    conv_f = conv_w_ref.shape[0]
    conv = jnp.dot(conv_w_ref[...], patches_ref[0],
                   preferred_element_type=f32)                 # (conv_f, OH*OW)
    conv = jnp.maximum(conv + conv_b_ref[...], 0.0)            # bias + ReLU (f32)

    # encoder fc: contract over (conv_f, OH*OW) with no in-kernel flatten by
    # unrolling the small static conv_f axis (8 tiny bf16 MXU matmuls).
    z_logits = enc_b_ref[...]                                  # (1, nz) f32
    for f in range(conv_f):
        z_logits = z_logits + jnp.dot(
            conv[f:f + 1, :].astype(bf16), enc_w_ref[f],
            preferred_element_type=f32)                        # (1, nz)

    # ---- lane-dense (1,nz) <-> (nd,zd) conversion via exact 0/1 matmuls ------
    # P[d,i] = 1 iff i in [d*zd, (d+1)*zd);  G[i,k] = Gt[k,i] = 1 iff i%zd == k.
    lane = lax.broadcasted_iota(jnp.int32, (nd, nz), 1)
    dlow = lax.broadcasted_iota(jnp.int32, (nd, nz), 0) * zd
    P = ((lane >= dlow) & (lane < dlow + zd)).astype(f32)      # (nd, nz)
    gi = lax.broadcasted_iota(jnp.int32, (nz, zd), 0)
    gk = lax.broadcasted_iota(jnp.int32, (nz, zd), 1)
    G = (_mod_const(gi, zd) == gk).astype(f32)                 # (nz, zd)
    ti = lax.broadcasted_iota(jnp.int32, (zd, nz), 1)
    tk = lax.broadcasted_iota(jnp.int32, (zd, nz), 0)
    Gt = (_mod_const(ti, zd) == tk).astype(f32)                # (zd, nz)

    # unflatten logits: (1, nz) -> (nd, zd)  (exact selection, stays f32)
    zl_b = jnp.broadcast_to(z_logits, (nd, nz))
    zl2 = jnp.dot(zl_b * P, G, preferred_element_type=f32)     # (nd, zd)

    # ---- softmax + RelaxedOneHotCategorical rsample + KL(q || uniform) -------
    m = jnp.max(zl2, axis=-1, keepdims=True)
    e = jnp.exp(zl2 - m)
    s = jnp.sum(e, axis=-1, keepdims=True)
    probs = e * pl.reciprocal(s, approx=True)                  # EUP reciprocal
    log_probs = (zl2 - m) - jnp.log(s)

    u = jnp.clip(u_ref[0], 1e-6, 1.0 - 1e-6)                   # clamp in-kernel
    g = -jnp.log(-jnp.log(u))
    y = (log_probs + g) * (1.0 / temp)
    ym = jnp.max(y, axis=-1, keepdims=True)
    ye = jnp.exp(y - ym)
    z = ye * pl.reciprocal(jnp.sum(ye, axis=-1, keepdims=True), approx=True)

    # KL(Categorical(probs) || Categorical(uniform)) summed over distributions.
    kl = jnp.sum(jnp.sum(probs * log_probs, axis=-1, keepdims=True),
                 axis=0, keepdims=True) + nd * math.log(zd)    # (1, 1)

    # flatten the relaxed sample: (nd, zd) -> (1, nz)  (exact selection)
    z_flat = jnp.sum(jnp.dot(z, Gt, preferred_element_type=f32) * P,
                     axis=0, keepdims=True)                    # (1, nz)

    # ---- decoder trunk (Linear + ReLU) + Bernoulli-logits head ---------------
    dec_h = jnp.dot(z_flat.astype(bf16), dec_w_ref[...],
                    preferred_element_type=f32) + dec_b_ref[...]
    dec_h = jnp.maximum(dec_h, 0.0)
    px_logits = jnp.dot(dec_h.astype(bf16), prob_w_ref[...],
                        preferred_element_type=f32) + prob_b_ref[...]  # (1, CHW)

    # ---- ELBO = E[log p(x|z)] - KL --------------------------------------------
    x = x_ref[0]                                               # (1, CHW) f32
    l = px_logits
    # Bernoulli(logits=l).log_prob(x) == x*l - softplus(l); single softplus.
    # (log(1+t) here differs from log1p by <6e-8 absolute since t in (0, 1].)
    softplus = jnp.maximum(l, 0.0) + jnp.log(1.0 + jnp.exp(-jnp.abs(l)))
    ll = jnp.sum(x * l - softplus, axis=-1, keepdims=True)     # (1, 1)

    elbo_ref[0] = jnp.broadcast_to(ll - kl, (1, elbo_ref.shape[-1]))


# ----------------------------------------------------------------------------
# Wrapper glue: im2col (single cheap XLA rearrangement) + pallas_call
# ----------------------------------------------------------------------------
def im2col_t(x, kh, kw, stride, pad):
    """NCHW -> (B, C*kh*kw, OH*OW) patch matrix (rows ordered (c, kh, kw))."""
    B, C, H, W = x.shape
    xp = jnp.pad(x, ((0, 0), (0, 0), (pad, pad), (pad, pad)))
    OH = (H + 2 * pad - kh) // stride + 1
    OW = (W + 2 * pad - kw) // stride + 1
    taps = []
    for i in range(kh):
        for j in range(kw):
            taps.append(xp[:, :, i:i + stride * OH:stride, j:j + stride * OW:stride])
    p = jnp.stack(taps, axis=2)                      # (B, C, kh*kw, OH, OW)
    return p.reshape(B, C * kh * kw, OH * OW), OH, OW


def init_params(key, x_shape, z_dim, num_dists, h_dim, conv_f=8):
    C, H, W = x_shape
    OH, OW = H // 2, W // 2
    nz = num_dists * z_dim
    ks = jax.random.split(key, 4)
    sc = 0.05
    return {
        # SimpleCNN: Conv2d(C, conv_f, 3, s=2, p=1) + ReLU + Linear(conv_f*OH*OW, nz)
        "conv_w_t": (sc * jax.random.normal(ks[0], (conv_f, C * 9), jnp.float32)
                     ).astype(jnp.bfloat16),
        "conv_b": jnp.zeros((conv_f, 1), jnp.float32),
        # enc_w[f, s, :] == weight row of flattened feature (f, oh, ow); this is
        # the NCHW-flatten order the kernel produces, so no runtime transpose.
        "enc_w": (sc * jax.random.normal(ks[1], (conv_f, OH * OW, nz), jnp.float32)
                  ).astype(jnp.bfloat16),
        "enc_b": jnp.zeros((1, nz), jnp.float32),
        # SimpleTCNN decoder trunk: Linear(nz, h_dim) + ReLU
        "dec_w": (sc * jax.random.normal(ks[2], (nz, h_dim), jnp.float32)
                  ).astype(jnp.bfloat16),
        "dec_b": jnp.zeros((1, h_dim), jnp.float32),
        # Probabilities: Linear(h_dim, C*H*W) -> Bernoulli(logits)
        "prob_w": (sc * jax.random.normal(ks[3], (h_dim, C * H * W), jnp.float32)
                   ).astype(jnp.bfloat16),
        "prob_b": jnp.zeros((1, C * H * W), jnp.float32),
    }


def discrete_vae_forward(params, x, u, *, z_dim, num_dists, temp, return_elbo=True):
    B, C, H, W = x.shape
    nz = num_dists * z_dim
    conv_f = params["conv_w_t"].shape[0]
    h_dim = params["dec_w"].shape[1]
    chw = C * H * W

    patches_t, OH, OW = im2col_t(x, 3, 3, 2, 1)
    patches_t = patches_t.astype(jnp.bfloat16)       # bf16 MXU operand
    xr = x.reshape(B, 1, chw)

    kernel = functools.partial(_dvae_fused_kernel, temp=temp,
                               z_dim=z_dim, num_dists=num_dists)

    out = pl.pallas_call(
        kernel,
        out_shape=jax.ShapeDtypeStruct((B, 1, ELBO_LANES), jnp.float32),
        grid_spec=pltpu.PrefetchScalarGridSpec(
            num_scalar_prefetch=0,
            grid=(B,),
            in_specs=[
                pl.BlockSpec((1, C * 9, OH * OW), lambda b: (b, 0, 0)),
                pl.BlockSpec((1, 1, chw), lambda b: (b, 0, 0)),
                pl.BlockSpec((1, num_dists, z_dim), lambda b: (b, 0, 0)),
                pl.BlockSpec((conv_f, C * 9), lambda b: (0, 0)),
                pl.BlockSpec((conv_f, 1), lambda b: (0, 0)),
                pl.BlockSpec((conv_f, OH * OW, nz), lambda b: (0, 0, 0)),
                pl.BlockSpec((1, nz), lambda b: (0, 0)),
                pl.BlockSpec((nz, h_dim), lambda b: (0, 0)),
                pl.BlockSpec((1, h_dim), lambda b: (0, 0)),
                pl.BlockSpec((h_dim, chw), lambda b: (0, 0)),
                pl.BlockSpec((1, chw), lambda b: (0, 0)),
            ],
            out_specs=pl.BlockSpec((1, 1, ELBO_LANES), lambda b: (b, 0, 0)),
        ),
        compiler_params=pltpu.CompilerParams(
            dimension_semantics=("parallel",)),      # v7x: one program per TC
    )(patches_t, xr, u,
      params["conv_w_t"], params["conv_b"],
      params["enc_w"], params["enc_b"],
      params["dec_w"], params["dec_b"],
      params["prob_w"], params["prob_b"])

    elbo = out[:, 0, 0]                              # (B,)
    return (x, elbo) if return_elbo else x


# ----------------------------------------------------------------------------
if __name__ == "__main__":
    B = 2
    x_shape = (4, 16, 16)   # (C, H, W)
    z_dim = 8
    num_dists = 16
    h_dim = 32
    temp = 1.0

    key = jax.random.PRNGKey(0)
    kp, kx, ku = jax.random.split(key, 3)

    params = init_params(kp, x_shape, z_dim, num_dists, h_dim)
    x = jax.random.normal(kx, (B,) + x_shape, jnp.float32)
    # raw uniform(0,1) noise; the kernel clamps it before the gumbel transform
    u = jax.random.uniform(ku, (B, num_dists, z_dim), jnp.float32)

    fwd = jax.jit(functools.partial(discrete_vae_forward, z_dim=z_dim,
                                    num_dists=num_dists, temp=temp,
                                    return_elbo=True))
    x_out, elbo = fwd(params, x, u)
    jax.block_until_ready((x_out, elbo))

    assert x_out.shape == x.shape
    assert elbo.shape == (B,)
    assert bool(jnp.all(jnp.isfinite(elbo)))
    print("KERNEL_OK")
</pallas_src>

<mosaic_0001>
module attributes {stable_mosaic.version = 11 : i64} {
  func.func @_dvae_fused_kernel(%arg0: i32, %arg1: memref<1x36x64xbf16, #tpu.memory_space<vmem>>, %arg2: memref<1x1x1024xf32, #tpu.memory_space<vmem>>, %arg3: memref<1x16x8xf32, #tpu.memory_space<vmem>>, %arg4: memref<8x36xbf16, #tpu.memory_space<vmem>>, %arg5: memref<8x1xf32, #tpu.memory_space<vmem>>, %arg6: memref<8x64x128xbf16, #tpu.memory_space<vmem>>, %arg7: memref<1x128xf32, #tpu.memory_space<vmem>>, %arg8: memref<128x32xbf16, #tpu.memory_space<vmem>>, %arg9: memref<1x32xf32, #tpu.memory_space<vmem>>, %arg10: memref<32x1024xbf16, #tpu.memory_space<vmem>>, %arg11: memref<1x1024xf32, #tpu.memory_space<vmem>>, %arg12: memref<1x1x128xf32, #tpu.memory_space<vmem>>) attributes {dimension_semantics = [#tpu.dimension_semantics<parallel>], iteration_bounds = array<i64: 2>, scalar_prefetch = 0 : i64, scratch_operands = 0 : i64, tpu.core_type = #tpu.core_type<tc>, window_params = [{transform_indices = @transform_0, window_bounds = array<i64: 1, 36, 64>}, {transform_indices = @transform_1, window_bounds = array<i64: 1, 1, 1024>}, {transform_indices = @transform_2, window_bounds = array<i64: 1, 16, 8>}, {pipeline_mode = #tpu.pipeline_mode<synchronous>, transform_indices = @transform_3, window_bounds = array<i64: 8, 36>}, {pipeline_mode = #tpu.pipeline_mode<synchronous>, transform_indices = @transform_4, window_bounds = array<i64: 8, 1>}, {pipeline_mode = #tpu.pipeline_mode<synchronous>, transform_indices = @transform_5, window_bounds = array<i64: 8, 64, 128>}, {pipeline_mode = #tpu.pipeline_mode<synchronous>, transform_indices = @transform_6, window_bounds = array<i64: 1, 128>}, {pipeline_mode = #tpu.pipeline_mode<synchronous>, transform_indices = @transform_7, window_bounds = array<i64: 128, 32>}, {pipeline_mode = #tpu.pipeline_mode<synchronous>, transform_indices = @transform_8, window_bounds = array<i64: 1, 32>}, {pipeline_mode = #tpu.pipeline_mode<synchronous>, transform_indices = @transform_9, window_bounds = array<i64: 32, 1024>}, {pipeline_mode = #tpu.pipeline_mode<synchronous>, transform_indices = @transform_10, window_bounds = array<i64: 1, 1024>}, {transform_indices = @transform_11, window_bounds = array<i64: 1, 1, 128>}]} {
    %c0 = arith.constant 0 : index
    %c0_0 = arith.constant 0 : index
    %0 = vector.load %arg4[%c0, %c0_0] : memref<8x36xbf16, #tpu.memory_space<vmem>>, vector<8x36xbf16>
    %c0_1 = arith.constant 0 : index
    %c0_2 = arith.constant 0 : index
    %c0_3 = arith.constant 0 : index
    %1 = vector.load %arg1[%c0_1, %c0_2, %c0_3] : memref<1x36x64xbf16, #tpu.memory_space<vmem>>, vector<1x36x64xbf16>
    %2 = vector.shape_cast %1 : vector<1x36x64xbf16> to vector<36x64xbf16>
    %cst = arith.constant dense<0.000000e+00> : vector<8x64xf32>
    %3 = tpu.matmul %0, %2, %cst {dimension_numbers = #tpu.dot_dimension_numbers<[1], [0], [0], [1], [0, 0, 1, 1], [], []>} : vector<8x36xbf16>, vector<36x64xbf16>, vector<8x64xf32> -> vector<8x64xf32>
    %c0_4 = arith.constant 0 : index
    %c0_5 = arith.constant 0 : index
    %4 = vector.load %arg5[%c0_4, %c0_5] : memref<8x1xf32, #tpu.memory_space<vmem>>, vector<8x1xf32>
    %5 = vector.broadcast %4 : vector<8x1xf32> to vector<8x64xf32>
    %6 = arith.addf %3, %5 : vector<8x64xf32>
    %cst_6 = arith.constant 0.000000e+00 : f32
    %7 = vector.broadcast %cst_6 : f32 to vector<8x64xf32>
    %8 = arith.maximumf %6, %7 : vector<8x64xf32>
    %c0_7 = arith.constant 0 : index
    %c0_8 = arith.constant 0 : index
    %9 = vector.load %arg7[%c0_7, %c0_8] : memref<1x128xf32, #tpu.memory_space<vmem>>, vector<1x128xf32>
    %10 = vector.extract_strided_slice %8 {offsets = [0, 0], sizes = [1, 64], strides = [1, 1]} : vector<8x64xf32> to vector<1x64xf32>
    %11 = arith.truncf %10 : vector<1x64xf32> to vector<1x64xbf16>
    %c0_9 = arith.constant 0 : index
    %c0_10 = arith.constant 0 : index
    %c0_11 = arith.constant 0 : index
    %12 = vector.load %arg6[%c0_9, %c0_10, %c0_11] : memref<8x64x128xbf16, #tpu.memory_space<vmem>>, vector<1x64x128xbf16>
    %13 = vector.shape_cast %12 : vector<1x64x128xbf16> to vector<64x128xbf16>
    %cst_12 = arith.constant dense<0.000000e+00> : vector<1x128xf32>
    %14 = tpu.matmul %11, %13, %cst_12 {dimension_numbers = #tpu.dot_dimension_numbers<[1], [0], [0], [1], [0, 0, 1, 1], [], []>} : vector<1x64xbf16>, vector<64x128xbf16>, vector<1x128xf32> -> vector<1x128xf32>
    %15 = arith.addf %9, %14 : vector<1x128xf32>
    %16 = vector.extract_strided_slice %8 {offsets = [1, 0], sizes = [1, 64], strides = [1, 1]} : vector<8x64xf32> to vector<1x64xf32>
    %17 = arith.truncf %16 : vector<1x64xf32> to vector<1x64xbf16>
    %c1 = arith.constant 1 : index
    %c0_13 = arith.constant 0 : index
    %c0_14 = arith.constant 0 : index
    %18 = vector.load %arg6[%c1, %c0_13, %c0_14] : memref<8x64x128xbf16, #tpu.memory_space<vmem>>, vector<1x64x128xbf16>
    %19 = vector.shape_cast %18 : vector<1x64x128xbf16> to vector<64x128xbf16>
    %cst_15 = arith.constant dense<0.000000e+00> : vector<1x128xf32>
    %20 = tpu.matmul %17, %19, %cst_15 {dimension_numbers = #tpu.dot_dimension_numbers<[1], [0], [0], [1], [0, 0, 1, 1], [], []>} : vector<1x64xbf16>, vector<64x128xbf16>, vector<1x128xf32> -> vector<1x128xf32>
    %21 = arith.addf %15, %20 : vector<1x128xf32>
    %22 = vector.extract_strided_slice %8 {offsets = [2, 0], sizes = [1, 64], strides = [1, 1]} : vector<8x64xf32> to vector<1x64xf32>
    %23 = arith.truncf %22 : vector<1x64xf32> to vector<1x64xbf16>
    %c2 = arith.constant 2 : index
    %c0_16 = arith.constant 0 : index
    %c0_17 = arith.constant 0 : index
    %24 = vector.load %arg6[%c2, %c0_16, %c0_17] : memref<8x64x128xbf16, #tpu.memory_space<vmem>>, vector<1x64x128xbf16>
    %25 = vector.shape_cast %24 : vector<1x64x128xbf16> to vector<64x128xbf16>
    %cst_18 = arith.constant dense<0.000000e+00> : vector<1x128xf32>
    %26 = tpu.matmul %23, %25, %cst_18 {dimension_numbers = #tpu.dot_dimension_numbers<[1], [0], [0], [1], [0, 0, 1, 1], [], []>} : vector<1x64xbf16>, vector<64x128xbf16>, vector<1x128xf32> -> vector<1x128xf32>
    %27 = arith.addf %21, %26 : vector<1x128xf32>
    %28 = vector.extract_strided_slice %8 {offsets = [3, 0], sizes = [1, 64], strides = [1, 1]} : vector<8x64xf32> to vector<1x64xf32>
    %29 = arith.truncf %28 : vector<1x64xf32> to vector<1x64xbf16>
    %c3 = arith.constant 3 : index
    %c0_19 = arith.constant 0 : index
    %c0_20 = arith.constant 0 : index
    %30 = vector.load %arg6[%c3, %c0_19, %c0_20] : memref<8x64x128xbf16, #tpu.memory_space<vmem>>, vector<1x64x128xbf16>
    %31 = vector.shape_cast %30 : vector<1x64x128xbf16> to vector<64x128xbf16>
    %cst_21 = arith.constant dense<0.000000e+00> : vector<1x128xf32>
    %32 = tpu.matmul %29, %31, %cst_21 {dimension_numbers = #tpu.dot_dimension_numbers<[1], [0], [0], [1], [0, 0, 1, 1], [], []>} : vector<1x64xbf16>, vector<64x128xbf16>, vector<1x128xf32> -> vector<1x128xf32>
    %33 = arith.addf %27, %32 : vector<1x128xf32>
    %34 = vector.extract_strided_slice %8 {offsets = [4, 0], sizes = [1, 64], strides = [1, 1]} : vector<8x64xf32> to vector<1x64xf32>
    %35 = arith.truncf %34 : vector<1x64xf32> to vector<1x64xbf16>
    %c4 = arith.constant 4 : index
    %c0_22 = arith.constant 0 : index
    %c0_23 = arith.constant 0 : index
    %36 = vector.load %arg6[%c4, %c0_22, %c0_23] : memref<8x64x128xbf16, #tpu.memory_space<vmem>>, vector<1x64x128xbf16>
    %37 = vector.shape_cast %36 : vector<1x64x128xbf16> to vector<64x128xbf16>
    %cst_24 = arith.constant dense<0.000000e+00> : vector<1x128xf32>
    %38 = tpu.matmul %35, %37, %cst_24 {dimension_numbers = #tpu.dot_dimension_numbers<[1], [0], [0], [1], [0, 0, 1, 1], [], []>} : vector<1x64xbf16>, vector<64x128xbf16>, vector<1x128xf32> -> vector<1x128xf32>
    %39 = arith.addf %33, %38 : vector<1x128xf32>
    %40 = vector.extract_strided_slice %8 {offsets = [5, 0], sizes = [1, 64], strides = [1, 1]} : vector<8x64xf32> to vector<1x64xf32>
    %41 = arith.truncf %40 : vector<1x64xf32> to vector<1x64xbf16>
    %c5 = arith.constant 5 : index
    %c0_25 = arith.constant 0 : index
    %c0_26 = arith.constant 0 : index
    %42 = vector.load %arg6[%c5, %c0_25, %c0_26] : memref<8x64x128xbf16, #tpu.memory_space<vmem>>, vector<1x64x128xbf16>
    %43 = vector.shape_cast %42 : vector<1x64x128xbf16> to vector<64x128xbf16>
    %cst_27 = arith.constant dense<0.000000e+00> : vector<1x128xf32>
    %44 = tpu.matmul %41, %43, %cst_27 {dimension_numbers = #tpu.dot_dimension_numbers<[1], [0], [0], [1], [0, 0, 1, 1], [], []>} : vector<1x64xbf16>, vector<64x128xbf16>, vector<1x128xf32> -> vector<1x128xf32>
    %45 = arith.addf %39, %44 : vector<1x128xf32>
    %46 = vector.extract_strided_slice %8 {offsets = [6, 0], sizes = [1, 64], strides = [1, 1]} : vector<8x64xf32> to vector<1x64xf32>
    %47 = arith.truncf %46 : vector<1x64xf32> to vector<1x64xbf16>
    %c6 = arith.constant 6 : index
    %c0_28 = arith.constant 0 : index
    %c0_29 = arith.constant 0 : index
    %48 = vector.load %arg6[%c6, %c0_28, %c0_29] : memref<8x64x128xbf16, #tpu.memory_space<vmem>>, vector<1x64x128xbf16>
    %49 = vector.shape_cast %48 : vector<1x64x128xbf16> to vector<64x128xbf16>
    %cst_30 = arith.constant dense<0.000000e+00> : vector<1x128xf32>
    %50 = tpu.matmul %47, %49, %cst_30 {dimension_numbers = #tpu.dot_dimension_numbers<[1], [0], [0], [1], [0, 0, 1, 1], [], []>} : vector<1x64xbf16>, vector<64x128xbf16>, vector<1x128xf32> -> vector<1x128xf32>
    %51 = arith.addf %45, %50 : vector<1x128xf32>
    %52 = vector.extract_strided_slice %8 {offsets = [7, 0], sizes = [1, 64], strides = [1, 1]} : vector<8x64xf32> to vector<1x64xf32>
    %53 = arith.truncf %52 : vector<1x64xf32> to vector<1x64xbf16>
    %c7 = arith.constant 7 : index
    %c0_31 = arith.constant 0 : index
    %c0_32 = arith.constant 0 : index
    %54 = vector.load %arg6[%c7, %c0_31, %c0_32] : memref<8x64x128xbf16, #tpu.memory_space<vmem>>, vector<1x64x128xbf16>
    %55 = vector.shape_cast %54 : vector<1x64x128xbf16> to vector<64x128xbf16>
    %cst_33 = arith.constant dense<0.000000e+00> : vector<1x128xf32>
    %56 = tpu.matmul %53, %55, %cst_33 {dimension_numbers = #tpu.dot_dimension_numbers<[1], [0], [0], [1], [0, 0, 1, 1], [], []>} : vector<1x64xbf16>, vector<64x128xbf16>, vector<1x128xf32> -> vector<1x128xf32>
    %57 = arith.addf %51, %56 : vector<1x128xf32>
    %58 = tpu.iota {dimensions = array<i32: 1>} : vector<16x128xi32>
    %59 = tpu.iota {dimensions = array<i32: 0>} : vector<16x128xi32>
    %c8_i32 = arith.constant 8 : i32
    %60 = vector.broadcast %c8_i32 : i32 to vector<16x128xi32>
    %61 = arith.muli %59, %60 : vector<16x128xi32>
    %62 = arith.cmpi sge, %58, %61 : vector<16x128xi32>
    %c8_i32_34 = arith.constant 8 : i32
    %63 = vector.broadcast %c8_i32_34 : i32 to vector<16x128xi32>
    %64 = arith.addi %61, %63 : vector<16x128xi32>
    %65 = arith.cmpi slt, %58, %64 : vector<16x128xi32>
    %66 = arith.andi %62, %65 : vector<16x128xi1>
    %67 = arith.extui %66 : vector<16x128xi1> to vector<16x128xi32>
    %68 = arith.sitofp %67 : vector<16x128xi32> to vector<16x128xf32>
    %69 = tpu.iota {dimensions = array<i32: 0>} : vector<128x8xi32>
    %70 = tpu.iota {dimensions = array<i32: 1>} : vector<128x8xi32>
    %c7_i32 = arith.constant 7 : i32
    %71 = vector.broadcast %c7_i32 : i32 to vector<128x8xi32>
    %72 = arith.andi %69, %71 : vector<128x8xi32>
    %73 = arith.cmpi eq, %72, %70 : vector<128x8xi32>
    %74 = arith.extui %73 : vector<128x8xi1> to vector<128x8xi32>
    %75 = arith.sitofp %74 : vector<128x8xi32> to vector<128x8xf32>
    %76 = tpu.iota {dimensions = array<i32: 1>} : vector<8x128xi32>
    %77 = tpu.iota {dimensions = array<i32: 0>} : vector<8x128xi32>
    %c7_i32_35 = arith.constant 7 : i32
    %78 = vector.broadcast %c7_i32_35 : i32 to vector<8x128xi32>
    %79 = arith.andi %76, %78 : vector<8x128xi32>
    %80 = arith.cmpi eq, %79, %77 : vector<8x128xi32>
    %81 = arith.extui %80 : vector<8x128xi1> to vector<8x128xi32>
    %82 = arith.sitofp %81 : vector<8x128xi32> to vector<8x128xf32>
    %83 = vector.shape_cast %57 : vector<1x128xf32> to vector<1x128xf32>
    %84 = vector.broadcast %83 : vector<1x128xf32> to vector<16x128xf32>
    %85 = arith.mulf %84, %68 : vector<16x128xf32>
    %cst_36 = arith.constant dense<0.000000e+00> : vector<16x8xf32>
    %86 = tpu.matmul %85, %75, %cst_36 {dimension_numbers = #tpu.dot_dimension_numbers<[1], [0], [0], [1], [0, 0, 1, 1], [], []>} : vector<16x128xf32>, vector<128x8xf32>, vector<16x8xf32> -> vector<16x8xf32>
    %cst_37 = arith.constant dense<0xFF800000> : vector<16xf32>
    %87 = vector.multi_reduction <maximumf>, %86, %cst_37 [1] : vector<16x8xf32> to vector<16xf32>
    %88 = vector.shape_cast %87 : vector<16xf32> to vector<16x1xf32>
    %89 = vector.broadcast %88 : vector<16x1xf32> to vector<16x8xf32>
    %90 = arith.subf %86, %89 : vector<16x8xf32>
    %91 = math.exp %90 : vector<16x8xf32>
    %cst_38 = arith.constant dense<0.000000e+00> : vector<16xf32>
    %92 = vector.multi_reduction <add>, %91, %cst_38 [1] : vector<16x8xf32> to vector<16xf32>
    %93 = vector.shape_cast %92 : vector<16xf32> to vector<16x1xf32>
    %94 = tpu.reciprocal %93 {approx = true} : vector<16x1xf32> -> vector<16x1xf32>
    %95 = vector.broadcast %94 : vector<16x1xf32> to vector<16x8xf32>
    %96 = arith.mulf %91, %95 : vector<16x8xf32>
    %97 = vector.broadcast %88 : vector<16x1xf32> to vector<16x8xf32>
    %98 = arith.subf %86, %97 : vector<16x8xf32>
    %99 = math.log %93 : vector<16x1xf32>
    %100 = vector.broadcast %99 : vector<16x1xf32> to vector<16x8xf32>
    %101 = arith.subf %98, %100 : vector<16x8xf32>
    %c0_39 = arith.constant 0 : index
    %c0_40 = arith.constant 0 : index
    %c0_41 = arith.constant 0 : index
    %102 = vector.load %arg3[%c0_39, %c0_40, %c0_41] : memref<1x16x8xf32, #tpu.memory_space<vmem>>, vector<1x16x8xf32>
    %103 = vector.shape_cast %102 : vector<1x16x8xf32> to vector<16x8xf32>
    %cst_42 = arith.constant 9.99999997E-7 : f32
    %cst_43 = arith.constant 0.999998986 : f32
    %104 = vector.broadcast %cst_42 : f32 to vector<16x8xf32>
    %105 = arith.maximumf %104, %103 : vector<16x8xf32>
    %106 = vector.broadcast %cst_43 : f32 to vector<16x8xf32>
    %107 = arith.minimumf %106, %105 : vector<16x8xf32>
    %108 = math.log %107 : vector<16x8xf32>
    %cst_44 = arith.constant 0.000000e+00 : f32
    %109 = vector.broadcast %cst_44 : f32 to vector<16x8xf32>
    %110 = arith.subf %109, %108 : vector<16x8xf32>
    %111 = math.log %110 : vector<16x8xf32>
    %cst_45 = arith.constant 0.000000e+00 : f32
    %112 = vector.broadcast %cst_45 : f32 to vector<16x8xf32>
    %113 = arith.subf %112, %111 : vector<16x8xf32>
    %114 = arith.addf %101, %113 : vector<16x8xf32>
    %cst_46 = arith.constant 1.000000e+00 : f32
    %115 = vector.broadcast %cst_46 : f32 to vector<16x8xf32>
    %116 = arith.mulf %114, %115 : vector<16x8xf32>
    %cst_47 = arith.constant dense<0xFF800000> : vector<16xf32>
    %117 = vector.multi_reduction <maximumf>, %116, %cst_47 [1] : vector<16x8xf32> to vector<16xf32>
    %118 = vector.shape_cast %117 : vector<16xf32> to vector<16x1xf32>
    %119 = vector.broadcast %118 : vector<16x1xf32> to vector<16x8xf32>
    %120 = arith.subf %116, %119 : vector<16x8xf32>
    %121 = math.exp %120 : vector<16x8xf32>
    %cst_48 = arith.constant dense<0.000000e+00> : vector<16xf32>
    %122 = vector.multi_reduction <add>, %121, %cst_48 [1] : vector<16x8xf32> to vector<16xf32>
    %123 = vector.shape_cast %122 : vector<16xf32> to vector<16x1xf32>
    %124 = tpu.reciprocal %123 {approx = true} : vector<16x1xf32> -> vector<16x1xf32>
    %125 = vector.broadcast %124 : vector<16x1xf32> to vector<16x8xf32>
    %126 = arith.mulf %121, %125 : vector<16x8xf32>
    %127 = arith.mulf %96, %101 : vector<16x8xf32>
    %cst_49 = arith.constant dense<0.000000e+00> : vector<16xf32>
    %128 = vector.multi_reduction <add>, %127, %cst_49 [1] : vector<16x8xf32> to vector<16xf32>
    %129 = vector.shape_cast %128 : vector<16xf32> to vector<16x1xf32>
    %cst_50 = arith.constant dense<0.000000e+00> : vector<1xf32>
    %130 = vector.multi_reduction <add>, %129, %cst_50 [0] : vector<16x1xf32> to vector<1xf32>
    %131 = vector.shape_cast %130 : vector<1xf32> to vector<1x1xf32>
    %cst_51 = arith.constant 33.2710648 : f32
    %132 = vector.broadcast %cst_51 : f32 to vector<1x1xf32>
    %133 = arith.addf %131, %132 : vector<1x1xf32>
    %cst_52 = arith.constant dense<0.000000e+00> : vector<16x128xf32>
    %134 = tpu.matmul %126, %82, %cst_52 {dimension_numbers = #tpu.dot_dimension_numbers<[1], [0], [0], [1], [0, 0, 1, 1], [], []>} : vector<16x8xf32>, vector<8x128xf32>, vector<16x128xf32> -> vector<16x128xf32>
    %135 = arith.mulf %134, %68 : vector<16x128xf32>
    %cst_53 = arith.constant dense<0.000000e+00> : vector<128xf32>
    %136 = vector.multi_reduction <add>, %135, %cst_53 [0] : vector<16x128xf32> to vector<128xf32>
    %137 = vector.shape_cast %136 : vector<128xf32> to vector<1x128xf32>
    %138 = arith.truncf %137 : vector<1x128xf32> to vector<1x128xbf16>
    %c0_54 = arith.constant 0 : index
    %c0_55 = arith.constant 0 : index
    %139 = vector.load %arg8[%c0_54, %c0_55] : memref<128x32xbf16, #tpu.memory_space<vmem>>, vector<128x32xbf16>
    %cst_56 = arith.constant dense<0.000000e+00> : vector<1x32xf32>
    %140 = tpu.matmul %138, %139, %cst_56 {dimension_numbers = #tpu.dot_dimension_numbers<[1], [0], [0], [1], [0, 0, 1, 1], [], []>} : vector<1x128xbf16>, vector<128x32xbf16>, vector<1x32xf32> -> vector<1x32xf32>
    %c0_57 = arith.constant 0 : index
    %c0_58 = arith.constant 0 : index
    %141 = vector.load %arg9[%c0_57, %c0_58] : memref<1x32xf32, #tpu.memory_space<vmem>>, vector<1x32xf32>
    %142 = arith.addf %140, %141 : vector<1x32xf32>
    %cst_59 = arith.constant 0.000000e+00 : f32
    %143 = vector.broadcast %cst_59 : f32 to vector<1x32xf32>
    %144 = arith.maximumf %142, %143 : vector<1x32xf32>
    %145 = arith.truncf %144 : vector<1x32xf32> to vector<1x32xbf16>
    %c0_60 = arith.constant 0 : index
    %c0_61 = arith.constant 0 : index
    %146 = vector.load %arg10[%c0_60, %c0_61] : memref<32x1024xbf16, #tpu.memory_space<vmem>>, vector<32x1024xbf16>
    %cst_62 = arith.constant dense<0.000000e+00> : vector<1x1024xf32>
    %147 = tpu.matmul %145, %146, %cst_62 {dimension_numbers = #tpu.dot_dimension_numbers<[1], [0], [0], [1], [0, 0, 1, 1], [], []>} : vector<1x32xbf16>, vector<32x1024xbf16>, vector<1x1024xf32> -> vector<1x1024xf32>
    %c0_63 = arith.constant 0 : index
    %c0_64 = arith.constant 0 : index
    %148 = vector.load %arg11[%c0_63, %c0_64] : memref<1x1024xf32, #tpu.memory_space<vmem>>, vector<1x1024xf32>
    %149 = arith.addf %147, %148 : vector<1x1024xf32>
    %c0_65 = arith.constant 0 : index
    %c0_66 = arith.constant 0 : index
    %c0_67 = arith.constant 0 : index
    %150 = vector.load %arg2[%c0_65, %c0_66, %c0_67] : memref<1x1x1024xf32, #tpu.memory_space<vmem>>, vector<1x1x1024xf32>
    %151 = vector.shape_cast %150 : vector<1x1x1024xf32> to vector<1x1024xf32>
    %cst_68 = arith.constant 0.000000e+00 : f32
    %152 = vector.broadcast %cst_68 : f32 to vector<1x1024xf32>
    %153 = arith.maximumf %149, %152 : vector<1x1024xf32>
    %154 = math.absf %149 : vector<1x1024xf32>
    %cst_69 = arith.constant 0.000000e+00 : f32
    %155 = vector.broadcast %cst_69 : f32 to vector<1x1024xf32>
    %156 = arith.subf %155, %154 : vector<1x1024xf32>
    %157 = math.exp %156 : vector<1x1024xf32>
    %cst_70 = arith.constant 1.000000e+00 : f32
    %158 = vector.broadcast %cst_70 : f32 to vector<1x1024xf32>
    %159 = arith.addf %158, %157 : vector<1x1024xf32>
    %160 = math.log %159 : vector<1x1024xf32>
    %161 = arith.addf %153, %160 : vector<1x1024xf32>
    %162 = arith.mulf %151, %149 : vector<1x1024xf32>
    %163 = arith.subf %162, %161 : vector<1x1024xf32>
    %cst_71 = arith.constant dense<0.000000e+00> : vector<1xf32>
    %164 = vector.multi_reduction <add>, %163, %cst_71 [1] : vector<1x1024xf32> to vector<1xf32>
    %165 = vector.shape_cast %164 : vector<1xf32> to vector<1x1xf32>
    %166 = arith.subf %165, %133 : vector<1x1xf32>
    %167 = vector.shape_cast %166 : vector<1x1xf32> to vector<1x1xf32>
    %168 = vector.broadcast %167 : vector<1x1xf32> to vector<1x128xf32>
    %c0_72 = arith.constant 0 : index
    %c0_73 = arith.constant 0 : index
    %c0_74 = arith.constant 0 : index
    %169 = vector.load %arg12[%c0_72, %c0_73, %c0_74] : memref<1x1x128xf32, #tpu.memory_space<vmem>>, vector<1x1x128xf32>
    %170 = vector.shape_cast %169 : vector<1x1x128xf32> to vector<1x128xf32>
    %171 = vector.shape_cast %168 : vector<1x128xf32> to vector<1x1x128xf32>
    tpu.vector_store %arg12[%c0_72, %c0_73, %c0_74], %171 {strides = array<i32>} : memref<1x1x128xf32, #tpu.memory_space<vmem>>, vector<1x1x128xf32>,
    return
  }
  func.func @transform_0(%arg0: i32) -> (i32, i32, i32) {
    %c0_i32 = arith.constant 0 : i32
    %c0_i32_0 = arith.constant 0 : i32
    %c0_i32_1 = arith.constant 0 : i32
    return %arg0, %c0_i32, %c0_i32_0 : i32, i32, i32
  }
  func.func @transform_1(%arg0: i32) -> (i32, i32, i32) {
    %c0_i32 = arith.constant 0 : i32
    %c0_i32_0 = arith.constant 0 : i32
    %c0_i32_1 = arith.constant 0 : i32
    return %arg0, %c0_i32, %c0_i32_0 : i32, i32, i32
  }
  func.func @transform_2(%arg0: i32) -> (i32, i32, i32) {
    %c0_i32 = arith.constant 0 : i32
    %c0_i32_0 = arith.constant 0 : i32
    %c0_i32_1 = arith.constant 0 : i32
    return %arg0, %c0_i32, %c0_i32_0 : i32, i32, i32
  }
  func.func @transform_3(%arg0: i32) -> (i32, i32) {
    %c0_i32 = arith.constant 0 : i32
    %c0_i32_0 = arith.constant 0 : i32
    %c0_i32_1 = arith.constant 0 : i32
    return %c0_i32, %c0_i32_0 : i32, i32
  }
  func.func @transform_4(%arg0: i32) -> (i32, i32) {
    %c0_i32 = arith.constant 0 : i32
    %c0_i32_0 = arith.constant 0 : i32
    %c0_i32_1 = arith.constant 0 : i32
    return %c0_i32, %c0_i32_0 : i32, i32
  }
  func.func @transform_5(%arg0: i32) -> (i32, i32, i32) {
    %c0_i32 = arith.constant 0 : i32
    %c0_i32_0 = arith.constant 0 : i32
    %c0_i32_1 = arith.constant 0 : i32
    %c0_i32_2 = arith.constant 0 : i32
    return %c0_i32, %c0_i32_0, %c0_i32_1 : i32, i32, i32
  }
  func.func @transform_6(%arg0: i32) -> (i32, i32) {
    %c0_i32 = arith.constant 0 : i32
    %c0_i32_0 = arith.constant 0 : i32
    %c0_i32_1 = arith.constant 0 : i32
    return %c0_i32, %c0_i32_0 : i32, i32
  }
  func.func @transform_7(%arg0: i32) -> (i32, i32) {
    %c0_i32 = arith.constant 0 : i32
    %c0_i32_0 = arith.constant 0 : i32
    %c0_i32_1 = arith.constant 0 : i32
    return %c0_i32, %c0_i32_0 : i32, i32
  }
  func.func @transform_8(%arg0: i32) -> (i32, i32) {
    %c0_i32 = arith.constant 0 : i32
    %c0_i32_0 = arith.constant 0 : i32
    %c0_i32_1 = arith.constant 0 : i32
    return %c0_i32, %c0_i32_0 : i32, i32
  }
  func.func @transform_9(%arg0: i32) -> (i32, i32) {
    %c0_i32 = arith.constant 0 : i32
    %c0_i32_0 = arith.constant 0 : i32
    %c0_i32_1 = arith.constant 0 : i32
    return %c0_i32, %c0_i32_0 : i32, i32
  }
  func.func @transform_10(%arg0: i32) -> (i32, i32) {
    %c0_i32 = arith.constant 0 : i32
    %c0_i32_0 = arith.constant 0 : i32
    %c0_i32_1 = arith.constant 0 : i32
    return %c0_i32, %c0_i32_0 : i32, i32
  }
  func.func @transform_11(%arg0: i32) -> (i32, i32, i32) {
    %c0_i32 = arith.constant 0 : i32
    %c0_i32_0 = arith.constant 0 : i32
    %c0_i32_1 = arith.constant 0 : i32
    return %arg0, %c0_i32, %c0_i32_0 : i32, i32, i32
  }
}

</mosaic_0001>

<bundles_post_ra>
// kernel: discrete_vae_forward.1
= control target key start
LH: loop header
LB: loop body
LE: loop exit
PB: predicated region body
PF: predicated region fallthrough
CT: control target
= control target key end

     0   :  { %s2894_s17 = smov 0   ;;  %s3485_s0 = inlined_call_operand.vmem [shape: bf16[2,36,64], index: 0, kind: input, shape index: {}]   ;;  %s3486_s1 = inlined_call_operand.vmem [shape: f32[2,1,1024], index: 1, kind: input, shape index: {}]   ;;  %s3487_s2 = inlined_call_operand.vmem [shape: f32[2,16,8], index: 2, kind: input, shape index: {}]   ;;  %s3488_s3 = inlined_call_operand.vmem [shape: bf16[8,36], index: 3, kind: input, shape index: {}]   ;;  %s3489_s4 = inlined_call_operand.vmem [shape: f32[8,1], index: 4, kind: input, shape index: {}]   ;;  %s3490_s5 = inlined_call_operand.vmem [shape: bf16[8,64,128], index: 5, kind: input, shape index: {}]   ;;  %s3491_s6 = inlined_call_operand.vmem [shape: f32[1,128], index: 6, kind: input, shape index: {}]   ;;  %s3492_s7 = inlined_call_operand.vmem [shape: bf16[128,32], index: 7, kind: input, shape index: {}]   ;;  %s3493_s8 = inlined_call_operand.vmem [shape: f32[1,32], index: 8, kind: input, shape index: {}]   ;;  %s3494_s9 = inlined_call_operand.vmem [shape: bf16[32,1024], index: 9, kind: input, shape index: {}]   ;;  %s3495_s10 = inlined_call_operand.vmem [shape: f32[1,1024], index: 10, kind: input, shape index: {}]   ;;  %s3496_s11 = inlined_call_operand.vmem [shape: f32[2,1,128], index: 11, kind: output, shape index: {}]  }
   0x1 LB: > { %s2222_s18 = sadd.s32 4294967295, %s2826_s17   ;;  %p2226_p0 = scmp.ge.s32.totalorder %s2826_s17, 1  ;;  %s2826_s17 = sphi %s2894_s17, %s21_s17  }
   0x2   : > { %p356_p1 = scmp.lt.s32.totalorder %s2826_s17, 3 }
   0x4   : > { %p357_p2 = pnand %p2226_p0, %p356_p1 }
   0x5   : > { %p403_p3 = scmp.lt.s32.totalorder (!%p357_p2), %s2222_s18, 1  ;;  %v2828_v0 = vmov (!%p357_p2), 0.0   ;;  %vm2829_vm0 = vmmov (!%p357_p2), 0   ;;  %v427_v1 = vld [vmem:[%s3489_s4] sm:$0xff] (!%p357_p2)  ;;  %v2830_v3 = vmov (!%p357_p2), 0   ;;  %v2721_v4 = vld [vmem:[%s3490_s5 + $0x8] sm:$0xff] (!%p357_p2)   ;;  %v1124_v12 = vlaneseq (!%p357_p2) }
   0x6   : > { %360 = sbr.rel (%p357_p2) target bundleno = 2324 (0x914), region = 64  ;;  %2474 = vmatprep.subr.bf16.mxu0 (!%p357_p2), %v2828_v0  ;;  %2480 = vmatprep.mubr.msk.bf16.mxu0 (!%p357_p2), %vm2829_vm0, %v2828_v0  ;;  %v2720_v2 = vld [vmem:[%s3490_s5] sm:$0xff] (!%p357_p2)   ;;  %v2722_v5 = vld [vmem:[%s3490_s5 + $0x10] sm:$0xff] (!%p357_p2)   ;;  %vm452_vm1 = vcmask (!%p357_p2), 1041408   ;;  %vm448_vm2 = vcmask (!%p357_p2), 293888   ;;  %v2723_v11 = vld [vmem:[%s3490_s5 + $0x18] sm:$0xff] (!%p357_p2)  }
   0x7   : > { %2716 = vset.pattern.permute.xlu0 (!%p357_p2), %v2830_v3  ;;  %2484 = vmatprep.subr.bf16.mxu1 (!%p357_p2), %v2828_v0  ;;  %v421_v10 = vld [vmem:[%s3488_s3] sm:$0xf] (!%p357_p2)  ;;  %v2939_v13 = vand.u32 (!%p357_p2), 127, %v1124_v12  ;;  %v2941_v14 = vshrl.u32 (!%p357_p2), %v1124_v12, 7  ;;  %v2831_v39 = vmov (!%p357_p2), 1.0|1.0  }
   0x8   : > { %430 = vperm.xlu0 (!%p357_p2), %2716, %v427_v1   ;;  %2485 = vmatpush3.bf16.msra.mxu1 (!%p357_p2), %v2720_v2  ;;  %vm531_vm11 = vcmask (!%p357_p2), 523264   ;;  %v2724_v46 = vld [vmem:[%s3490_s5 + $0x20] sm:$0xff] (!%p357_p2)   ;;  %v2725_v54 = vld [vmem:[%s3490_s5 + $0x28] sm:$0xff] (!%p357_p2)   ;;  %v2726_v59 = vld [vmem:[%s3490_s5 + $0x30] sm:$0xff] (!%p357_p2)  }
   0x9   : > { %2486 = vmatprep.subr.bf16.mxu1 (!%p357_p2), %v2828_v0  ;;  %2492 = vmatprep.mubr.msk.bf16.mxu1 (!%p357_p2), %vm2829_vm0, %v2828_v0  ;;  %v2944_v15 = vadd.s32 (!%p357_p2), 8, %v2941_v14  ;;  %v1157_v16 = vand.u32 (!%p357_p2), 7, %v2941_v14  ;;  %v1143_v17 = vadd.s32 (!%p357_p2), 16, %v2941_v14  ;;  %v1144_v18 = vadd.s32 (!%p357_p2), 24, %v2941_v14  ;;  %v2727_v60 = vld [vmem:[%s3490_s5 + $0x38] sm:$0xff] (!%p357_p2)   ;;  %v2728_v61 = vld [vmem:[%s3490_s5 + $0x40] sm:$0xff] (!%p357_p2)  }
   0xa   : > { %v1145_v19 = vadd.s32 (!%p357_p2), 32, %v2941_v14  ;;  %v1146_v20 = vadd.s32 (!%p357_p2), 40, %v2941_v14  ;;  %v1147_v21 = vadd.s32 (!%p357_p2), 48, %v2941_v14  ;;  %v1148_v22 = vadd.s32 (!%p357_p2), 56, %v2941_v14  ;;  %v2729_v63 = vld [vmem:[%s3490_s5 + $0x48] sm:$0xff] (!%p357_p2)   ;;  %v2730_v1 = vld [vmem:[%s3490_s5 + $0x50] sm:$0xff] (!%p357_p2)  }
   0xb   : > { %v1158_v23 = vand.u32 (!%p357_p2), 7, %v2944_v15  ;;  %vm2955_vm3 = vcmp.eq.s32.totalorder (!%p357_p2), %v1157_v16, %v2939_v13  ;;  %v1159_v25 = vand.u32 (!%p357_p2), 7, %v1143_v17  ;;  %v1160_v26 = vand.u32 (!%p357_p2), 7, %v1144_v18  ;;  %v2731_v2 = vld [vmem:[%s3490_s5 + $0x58] sm:$0xff] (!%p357_p2)   ;;  %v2738_v12 = vld [vmem:[%s3490_s5 + $0x90] sm:$0xff] (!%p357_p2)   ;;  %v2740_v17 = vld [vmem:[%s3490_s5 + $0xa0] sm:$0xff] (!%p357_p2)  }
   0xc   : > { %2487 = vmatpush3.bf16.msra.mxu1 (!%p357_p2), %v2721_v4  ;;  %v1161_v28 = vand.u32 (!%p357_p2), 7, %v1145_v19  ;;  %v1162_v29 = vand.u32 (!%p357_p2), 7, %v1146_v20  ;;  %v1163_v34 = vand.u32 (!%p357_p2), 7, %v1147_v21  ;;  %v1164_v35 = vand.u32 (!%p357_p2), 7, %v1148_v22  ;;  %v2732_v4 = vld [vmem:[%s3490_s5 + $0x60] sm:$0xff] (!%p357_p2)   ;;  %v2739_v16 = vld [vmem:[%s3490_s5 + $0x98] sm:$0xff] (!%p357_p2)  }
   0xd   : > { %s3518_s18 = smov (!%p403_p3, %s2222_s18), 1  ;;  %2488 = vmatprep.subr.bf16.mxu1 %v2828_v0  ;;  %vm2960_vm4 = vcmp.eq.s32.totalorder %v1158_v23, %v2939_v13  ;;  %vm2965_vm5 = vcmp.eq.s32.totalorder %v1159_v25, %v2939_v13  ;;  %vm2970_vm6 = vcmp.eq.s32.totalorder %v1160_v26, %v2939_v13  ;;  %v1149_v36 = vadd.s32 64, %v2941_v14  ;;  %v2741_v19 = vld [vmem:[%s3490_s5 + $0xa8] sm:$0xff]   ;;  %v2742_v20 = vld [vmem:[%s3490_s5 + $0xb0] sm:$0xff]   ;;  %v2743_v21 = vld [vmem:[%s3490_s5 + $0xb8] sm:$0xff]  }
   0xe   : > { %s2701_s25 = smul.u32 20, %s3518_s18  ;;  %vm2640_vm7 = vmpackc.low %vm2960_vm4, %vm2955_vm3  ;;  %vm2985_vm9 = vcmp.eq.s32.totalorder %v1161_v28, %v2939_v13  ;;  %vm2990_vm10 = vcmp.eq.s32.totalorder %v1162_v29, %v2939_v13  ;;  %v1150_v42 = vadd.s32 72, %v2941_v14  ;;  %vm3010_vm13 = vcmp.eq.s32.totalorder %v1163_v34, %v2939_v13  ;;  %v2744_v22 = vld [vmem:[%s3490_s5 + $0xc0] sm:$0xff]   ;;  %v2745_v24 = vld [vmem:[%s3490_s5 + $0xc8] sm:$0xff]   ;;  %s419_s19 = scalar_lea.vmem %s3496_s11, %s3518_s18 }
   0xf   : > { %vm2644_vm8 = vmpackc.low %vm2970_vm6, %vm2965_vm5  ;;  %vm3015_vm14 = vcmp.eq.s32.totalorder %v1164_v35, %v2939_v13  ;;  %v1165_v49 = vand.u32 7, %v1149_v36  ;;  %v1151_v52 = vadd.s32 80, %v2941_v14  ;;  %v1152_v53 = vadd.s32 88, %v2941_v14  ;;  %v2746_v25 = vld [vmem:[%s3490_s5 + $0xd0] sm:$0xff]   ;;  %v2747_v26 = vld [vmem:[%s3490_s5 + $0xd8] sm:$0xff]  }
  0x10   : > { %s407_s30 = scalar_lea.vmem %s3485_s0, %s2701_s25  ;;  %2489 = vmatpush3.bf16.msra.mxu1 %v2722_v5  ;;  %vm2648_vm12 = vmpackc.low %vm2990_vm10, %vm2985_vm9  ;;  %v1166_v51 = vand.u32 7, %v1150_v42  ;;  %v2749_v29 = vld [vmem:[%s3490_s5 + $0xe8] sm:$0xff]   ;;  %v2750_v30 = vld [vmem:[%s3490_s5 + $0xf0] sm:$0xff]   ;;  %v1154_v34 = vadd.s32 104, %v2941_v14  ;;  %v1130_v42 = vmul.u32 8, %v2944_v15  ;;  %s2399_s25 = sshll.u32 %s3518_s18, 4 }
  0x11   : > { %v2717_v6 = vld [vmem:[%s407_s30] sm:$0xff]   ;;  %v2718_v7 = vld [vmem:[%s407_s30 + $0x8] sm:$0xff]   ;;  %v2719_v8 = vld [vmem:[%s407_s30 + $0x10] ss:$0 sps:$4 sm:$0x33]   ;;  %2490 = vmatprep.subr.bf16.mxu1 %v2828_v0  ;;  %v1167_v57 = vand.u32 7, %v1151_v52  ;;  %s416_s28 = scalar_lea.vmem %s3487_s2, %s2399_s25 }
  0x12   : > { %2475 = vmatpush3.bf16.msra.mxu0 %v2717_v6  ;;  %v454_v9 = vsel %vm452_vm1, %v2719_v8, 0  ;;  %vm2652_vm15 = vmpackc.low %vm3015_vm14, %vm3010_vm13  ;;  %vm3048_vm1 = vcmp.eq.s32.totalorder %v1165_v49, %v2939_v13  ;;  %v1168_v58 = vand.u32 7, %v1152_v53  ;;  %v2733_v6 = vld [vmem:[%s3490_s5 + $0x68] sm:$0xff]   ;;  %v2735_v8 = vld [vmem:[%s3490_s5 + $0x78] sm:$0xff]   ;;  %v1170_v36 = vand.u32 7, %v1154_v34  ;;  %s2228_s30 = sshll.u32 %s3518_s18, 3 }
  0x13   : > { %2476 = vmatprep.subr.bf16.mxu0 %v2828_v0  ;;  %vm1183_vm4 = vcmp.eq.s32.totalorder %v1167_v57, %v2939_v13  ;;  %v2751_v31 = vld [vmem:[%s3490_s5 + $0xf8] sm:$0xff]   ;;  %vm1132_vm13 = vcmp.ge.s32.totalorder %v2939_v13, %v1130_v42  ;;  %s411_s14 = scalar_lea.vmem %s3486_s1, %s2228_s30 }
  0x14   : > { %2491 = vmatpush3.bf16.msra.mxu1 %v2723_v11  ;;  %vm1184_vm5 = vcmp.eq.s32.totalorder %v1168_v58, %v2939_v13  ;;  %v2737_v11 = vld [vmem:[%s3490_s5 + $0x88] sm:$0xff]  }
  0x15   : > { %2496 = vmatprep.subr.bf16.mxu1 %v2828_v0  ;;  %vm2660_vm6 = vmpackc.low %vm1184_vm5, %vm1183_vm4  ;;  %vm1308_vm4 = vcmask 64512  }
  0x16   : > { %2477 = vmatpush3.bf16.msra.mxu0 %v2718_v7  ;;  %v2734_v7 = vld [vmem:[%s3490_s5 + $0x70] sm:$0xff]  }
  0x17   : > { %2478 = vmatprep.subr.bf16.mxu0 %v2828_v0 }
  0x1a   : > { %2479 = vmatpush3.bf16.msra.mxu0 %v454_v9  ;;  %v2736_v9 = vld [vmem:[%s3490_s5 + $0x80] sm:$0xff]  }
  0x1b   : > { %2641 = vmatprep.subr.msk.bf16.mxu0 %vm2640_vm7, %v2831_v39 }
  0x1d   : > { %2481 = vmatmul.mubr.msk.bf16.vlgmr.msra.gmra.mrb[0].mxu0 %vm448_vm2, %v421_v10  ;;  %vm3053_vm2 = vcmp.eq.s32.totalorder %v1166_v51, %v2939_v13 }
  0x1e   : > { %2643 = vmatpush3.bf16.msk.msra.mxu0 %vm2640_vm7, %v2831_v39  ;;  %vm2656_vm3 = vmpackc.low %vm3053_vm2, %vm3048_vm1 }
  0x1f   : > { %2645 = vmatprep.subr.msk.bf16.mxu0 %vm2644_vm8, %v2831_v39 }
  0x22   : > { %2647 = vmatpush3.bf16.msk.msra.mxu0 %vm2644_vm8, %v2831_v39  ;;  %vm1186_vm8 = vcmp.eq.s32.totalorder %v1170_v36, %v2939_v13 }
  0x23   : > { %2649 = vmatprep.subr.msk.bf16.mxu0 %vm2648_vm12, %v2831_v39 }
  0x26   : > { %2651 = vmatpush3.bf16.msk.msra.mxu0 %vm2648_vm12, %v2831_v39 }
  0x27   : > { %2653 = vmatprep.subr.msk.bf16.mxu0 %vm2652_vm15, %v2831_v39 }
  0x2a   : > { %2655 = vmatpush3.bf16.msk.msra.mxu0 %vm2652_vm15, %v2831_v39 }
  0x2b   : > { %2657 = vmatprep.subr.msk.bf16.mxu0 %vm2656_vm3, %v2831_v39 }
  0x2e   : > { %2659 = vmatpush3.bf16.msk.msra.mxu0 %vm2656_vm3, %v2831_v39 }
  0x2f   : > { %2661 = vmatprep.subr.msk.bf16.mxu0 %vm2660_vm6, %v2831_v39 }
  0x32   : > { %2663 = vmatpush3.bf16.msk.msra.mxu0 %vm2660_vm6, %v2831_v39  ;;  %vm2131_vm6 = vcmask 1040384  }
  0x87   : > { %v431_v27 = vpop.permute.xlu0 %430 }
  0xf0   : > { %v490_v33 = vpop.f32.mrb[0].mxu0 }
  0xf1   : > { %v491_v37 = vadd.f32 %v490_v33, %v431_v27  ;;  %v2482_v38 = vpop.f32.mrb[1].mxu0  ;;  %v2748_v27 = vld [vmem:[%s3490_s5 + $0xe0] sm:$0xff]   ;;  %v1153_v33 = vadd.s32 96, %v2941_v14 }
  0xf2   : > { %v493_v43 = vpop.f32.mrb[2].mxu0  ;;  %v1156_v38 = vadd.s32 120, %v2941_v14 }
  0xf3   : > { %v496_v44 = vmax.f32 %v491_v37, 0.0  ;;  %v2483_v45 = vpop.f32.mrb[3].mxu0  ;;  %v1169_v35 = vand.u32 7, %v1153_v33  ;;  %v1155_v37 = vadd.s32 112, %v2941_v14  ;;  %v1129_v43 = vmul.u32 8, %v2941_v14 }
  0xf4   : > { %v1172_v41 = vand.u32 7, %v1156_v38 }
  0xf5   : > { %v3019_v50 = vpack.c.bf16 %v496_v44, %v496_v44  ;;  %vm1185_vm7 = vcmp.eq.s32.totalorder %v1169_v35, %v2939_v13  ;;  %v1171_v40 = vand.u32 7, %v1155_v37  ;;  %v1134_v44 = vadd.s32 8, %v1130_v42 }
  0xf6   : > { %vm2664_vm9 = vmpackc.low %vm1186_vm8, %vm1185_vm7  ;;  %v1133_v45 = vadd.s32 8, %v1129_v43  ;;  %vm1131_vm15 = vcmp.ge.s32.totalorder %v2939_v13, %v1129_v43 }
  0xf7   : > { %2493 = vmatmul.mubr.msk.bf16.vlgmr.msra.gmra.mrb[0].mxu1 %vm531_vm11, %v3019_v50  ;;  %v3086_v62 = vshrl.u32 %v3019_v50, 16  ;;  %v665_v5 = vrot.slane %v3019_v50, 1  ;;  %v821_v18 = vrot.slane %v3019_v50, 2  ;;  %v977_v28 = vrot.slane %v3019_v50, 3  ;;  %2665 = vmatprep.subr.msk.bf16.mxu0 %vm2664_vm9, %v2831_v39 }
  0xf8   : > { %2497 = vmatpush3.bf16.msra.mxu1 %v2724_v46  ;;  %2504 = vmatprep.mubr.msk.bf16.mxu1 %vm2829_vm0, %v2828_v0  ;;  %vm1187_vm10 = vcmp.eq.s32.totalorder %v1171_v40, %v2939_v13  ;;  %vm1136_vm14 = vcmp.lt.s32.totalorder %v2939_v13, %v1134_v44  ;;  %vm1135_vm1 = vcmp.lt.s32.totalorder %v2939_v13, %v1133_v45  ;;  %v497_v46 = vld [vmem:[%s3491_s6] sm:$0x1] }
  0xf9   : > { %2498 = vmatprep.subr.bf16.mxu1 %v2828_v0  ;;  %v743_v10 = vrot.slane %v3086_v62, 1  ;;  %v899_v23 = vrot.slane %v3086_v62, 2  ;;  %v1055_v32 = vrot.slane %v3086_v62, 3  ;;  %2667 = vmatpush3.bf16.msk.msra.mxu0 %vm2664_vm9, %v2831_v39  ;;  %vm1138_vm2 = vmand %vm1132_vm13, %vm1136_vm14 }
  0xfa   : > { %vm1137_vm3 = vmand %vm1131_vm15, %vm1135_vm1  ;;  %v3233_v49 = vsel %vm1138_vm2, 1.0, %v2828_v0 }
  0xfb   : > { %v3236_v51 = vsel %vm1137_vm3, 1.0, %v2828_v0 }
  0xfc   : > { %2499 = vmatpush3.bf16.msra.mxu1 %v2725_v54 }
  0xfd   : > { %2500 = vmatprep.subr.bf16.mxu1 %v2828_v0 }
 0x100   : > { %2501 = vmatpush3.bf16.msra.mxu1 %v2726_v59 }
 0x101   : > { %2502 = vmatprep.subr.bf16.mxu1 %v2828_v0 }
 0x104   : > { %2503 = vmatpush3.bf16.msra.mxu1 %v2727_v60 }
 0x105   : > { %2508 = vmatprep.subr.bf16.mxu1 %v2828_v0 }
 0x107   : > { %2505 = vmatmul.mubr.msk.bf16.vlgmr.msra.gmra.mrb[0].mxu1 %vm531_vm11, %v3086_v62 }
 0x108   : > { %2509 = vmatpush3.bf16.msra.mxu1 %v2728_v61  ;;  %2516 = vmatprep.mubr.msk.bf16.mxu1 %vm2829_vm0, %v2828_v0 }
 0x109   : > { %2510 = vmatprep.subr.bf16.mxu1 %v2828_v0 }
 0x10c   : > { %2511 = vmatpush3.bf16.msra.mxu1 %v2729_v63 }
 0x10d   : > { %2512 = vmatprep.subr.bf16.mxu1 %v2828_v0 }
 0x110   : > { %2513 = vmatpush3.bf16.msra.mxu1 %v2730_v1 }
 0x111   : > { %2514 = vmatprep.subr.bf16.mxu1 %v2828_v0 }
 0x114   : > { %2515 = vmatpush3.bf16.msra.mxu1 %v2731_v2 }
 0x115   : > { %2520 = vmatprep.subr.bf16.mxu1 %v2828_v0 }
 0x117   : > { %2517 = vmatmul.mubr.msk.bf16.vlgmr.msra.gmra.mrb[0].mxu1 %vm531_vm11, %v665_v5 }
 0x118   : > { %2521 = vmatpush3.bf16.msra.mxu1 %v2732_v4  ;;  %2528 = vmatprep.mubr.msk.bf16.mxu1 %vm2829_vm0, %v2828_v0 }
 0x119   : > { %2522 = vmatprep.subr.bf16.mxu1 %v2828_v0 }
 0x11c   : > { %2523 = vmatpush3.bf16.msra.mxu1 %v2733_v6 }
 0x11d   : > { %2524 = vmatprep.subr.bf16.mxu1 %v2828_v0 }
 0x120   : > { %2525 = vmatpush3.bf16.msra.mxu1 %v2734_v7 }
 0x121   : > { %2526 = vmatprep.subr.bf16.mxu1 %v2828_v0 }
 0x124   : > { %2527 = vmatpush3.bf16.msra.mxu1 %v2735_v8  ;;  %v1337_v8 = vld [vmem:[%s416_s28] sm:$0xff] }
 0x125   : > { %2532 = vmatprep.subr.bf16.mxu1 %v2828_v0 }
 0x127   : > { %2529 = vmatmul.mubr.msk.bf16.vlgmr.msra.gmra.mrb[0].mxu1 %vm531_vm11, %v743_v10  ;;  %v1338_v10 = vld [vmem:[%s416_s28 + $0x8] sm:$0xff] }
 0x128   : > { %2533 = vmatpush3.bf16.msra.mxu1 %v2736_v9  ;;  %2540 = vmatprep.mubr.msk.bf16.mxu1 %vm2829_vm0, %v2828_v0  ;;  %v1339_v9 = vmax.f32 %v1337_v8, 1e-06  ;;  %v2754_v8 = vld [vmem:[%s3492_s7 + $0x10] sm:$0xff]  }
 0x129   : > { %2534 = vmatprep.subr.bf16.mxu1 %v2828_v0 }
 0x12c   : > { %2535 = vmatpush3.bf16.msra.mxu1 %v2737_v11  ;;  %v1341_v11 = vmin.f32 %v1339_v9, 0.999999  ;;  %v2755_v9 = vld [vmem:[%s3492_s7 + $0x18] sm:$0xff]  }
 0x12d   : > { %2536 = vmatprep.subr.bf16.mxu1 %v2828_v0 }
 0x130   : > { %2537 = vmatpush3.bf16.msra.mxu1 %v2738_v12  ;;  %v1340_v12 = vmax.f32 %v1338_v10, 1e-06  ;;  %v2756_v10 = vld [vmem:[%s3492_s7 + $0x20] sm:$0xff]  }
 0x131   : > { %2538 = vmatprep.subr.bf16.mxu1 %v2828_v0 }
 0x134   : > { %2539 = vmatpush3.bf16.msra.mxu1 %v2739_v16  ;;  %v1342_v16 = vmin.f32 %v1340_v12, 0.999999  ;;  %v2758_v12 = vld [vmem:[%s3492_s7 + $0x30] sm:$0xff]  }
 0x135   : > { %2544 = vmatprep.subr.bf16.mxu1 %v2828_v0 }
 0x137   : > { %2541 = vmatmul.mubr.msk.bf16.vlgmr.msra.gmra.mrb[0].mxu1 %vm531_vm11, %v821_v18 }
 0x138   : > { %2545 = vmatpush3.bf16.msra.mxu1 %v2740_v17  ;;  %2552 = vmatprep.mubr.msk.bf16.mxu1 %vm2829_vm0, %v2828_v0 }
 0x139   : > { %2546 = vmatprep.subr.bf16.mxu1 %v2828_v0 }
 0x13c   : > { %2547 = vmatpush3.bf16.msra.mxu1 %v2741_v19 }
 0x13d   : > { %2548 = vmatprep.subr.bf16.mxu1 %v2828_v0 }
 0x140   : > { %2549 = vmatpush3.bf16.msra.mxu1 %v2742_v20 }
 0x141   : > { %2550 = vmatprep.subr.bf16.mxu1 %v2828_v0 }
 0x144   : > { %2551 = vmatpush3.bf16.msra.mxu1 %v2743_v21 }
 0x145   : > { %2556 = vmatprep.subr.bf16.mxu1 %v2828_v0 }
 0x147   : > { %2553 = vmatmul.mubr.msk.bf16.vlgmr.msra.gmra.mrb[0].mxu1 %vm531_vm11, %v899_v23 }
 0x148   : > { %2557 = vmatpush3.bf16.msra.mxu1 %v2744_v22  ;;  %2564 = vmatprep.mubr.msk.bf16.mxu1 %vm2829_vm0, %v2828_v0 }
 0x149   : > { %2558 = vmatprep.subr.bf16.mxu1 %v2828_v0 }
 0x14c   : > { %2559 = vmatpush3.bf16.msra.mxu1 %v2745_v24 }
 0x14d   : > { %2560 = vmatprep.subr.bf16.mxu1 %v2828_v0 }
 0x150   : > { %2561 = vmatpush3.bf16.msra.mxu1 %v2746_v25 }
 0x151   : > { %2562 = vmatprep.subr.bf16.mxu1 %v2828_v0 }
 0x154   : > { %2563 = vmatpush3.bf16.msra.mxu1 %v2747_v26 }
 0x155   : > { %2568 = vmatprep.subr.bf16.mxu1 %v2828_v0 }
 0x157   : > { %2565 = vmatmul.mubr.msk.bf16.vlgmr.msra.gmra.mrb[0].mxu1 %vm531_vm11, %v977_v28 }
 0x158   : > { %2569 = vmatpush3.bf16.msra.mxu1 %v2748_v27  ;;  %2576 = vmatprep.mubr.msk.bf16.mxu1 %vm2829_vm0, %v2828_v0 }
 0x159   : > { %2570 = vmatprep.subr.bf16.mxu1 %v2828_v0 }
 0x15c   : > { %2571 = vmatpush3.bf16.msra.mxu1 %v2749_v29 }
 0x15d   : > { %2572 = vmatprep.subr.bf16.mxu1 %v2828_v0 }
 0x160   : > { %2573 = vmatpush3.bf16.msra.mxu1 %v2750_v30 }
 0x161   : > { %2574 = vmatprep.subr.bf16.mxu1 %v2828_v0 }
 0x164   : > { %2575 = vmatpush3.bf16.msra.mxu1 %v2751_v31 }
 0x167   : > { %2577 = vmatmul.mubr.msk.bf16.vlgmr.msra.gmra.mrb[0].mxu1 %vm531_vm11, %v1055_v32  ;;  %vm1188_vm11 = vcmp.eq.s32.totalorder %v1172_v41, %v2939_v13 }
 0x168   : > { %vm2668_vm12 = vmpackc.low %vm1188_vm11, %vm1187_vm10 }
 0x169   : > { %2669 = vmatprep.subr.msk.bf16.mxu0 %vm2668_vm12, %v2831_v39 }
 0x16a   : > { %2671 = vmatpush3.bf16.msk.msra.mxu0 %vm2668_vm12, %v2831_v39  ;;  %v3230_v39 = vsub.s32 0, %v2941_v14 }
 0x23a   : > { %v1117_v15 = vpop.f32.mrb[0].mxu1 }
 0x23b   : > { %v2672_v47 = vadd.f32 %v1117_v15, %v497_v46  ;;  %v2578_v48 = vpop.f32.mrb[1].mxu1 }
 0x23c   : > { %v1120_v50 = vpop.f32.mrb[2].mxu1 }
 0x23d   : > { %v1229_v52 = vrot.slane %v2672_v47, %v3230_v39  ;;  %v2579_v53 = vpop.f32.mrb[3].mxu1 }
 0x23f   : > { %v1232_v54 = vmul.f32 %v3233_v49, %v1229_v52  ;;  %v1231_v55 = vmul.f32 %v3236_v51, %v1229_v52 }
 0x241   : > { %2612 = vmatprep.mubr.f32.mxu0 %v1231_v55 }
 0x242   : > { %2613 = vmatmul.mubr.f32.vlgmr.msra.gmra.mrb[4].mxu0 %v1232_v54 }
 0x315   : > { %v2614_v56 = vpop.f32.mrb[4].mxu0 }
 0x316   : > { %v1299_v57 = vpop.f32.mrb[5].mxu0  ;;  %v1312_v58 = vsel %vm1308_vm4, %v2614_v56, -inf }
 0x317   : > { %1313 = vmax.xlane.f32.xlu1 %v1312_v58  ;;  %v1309_v59 = vsel %vm1308_vm4, %v1299_v57, -inf }
 0x318   : > { %1310 = vmax.xlane.f32.xlu0 %v1309_v59 }
 0x3a4   : > { %v1314_v60 = vpop.xlane.xlu1 %1313 }
 0x3a5   : > { %v1316_v61 = vsub.f32 %v2614_v56, %v1314_v60  ;;  %v1311_v62 = vpop.xlane.xlu0 %1310 }
 0x3a6   : > { %v1315_v63 = vsub.f32 %v1299_v57, %v1311_v62  ;;  %v2832_v62 = vmov 1.0  }
 0x3a7   : > { %v1319_v1 = vmul.f32 1.442695, %v1316_v61 }
 0x3a8   : > { %v1317_v2 = vmul.f32 1.442695, %v1315_v63 }
 0x3aa   : > { %2760 = vpow2.f32 %v1317_v2 }
 0x3ab   : > { %2762 = vpow2.f32 %v1319_v1 }
 0x3ac   : > { %2764 = vlog2.f32 %v1341_v11  ;;  %v2757_v11 = vld [vmem:[%s3492_s7 + $0x28] sm:$0xff]  }
 0x3ad   : > { %2766 = vlog2.f32 %v1342_v16  ;;  %v2759_v16 = vld [vmem:[%s3492_s7 + $0x38] sm:$0xff]  }
 0x3b4   : > { %v2761_v4 = vpop.eup %2760 }
 0x3b5   : > { %v1321_v5 = vsel %vm1308_vm4, %v2761_v4, 0.0  ;;  %v3244_v6 = vpop.eup %2762 }
 0x3b6   : > { %1322 = vadd.xlane.f32.xlu1 %v1321_v5  ;;  %v1324_v7 = vsel %vm1308_vm4, %v3244_v6, 0.0  ;;  %v2765_v17 = vpop.eup %2764 }
 0x3b7   : > { %v1344_v18 = vmul.f32 0.6931472, %v2765_v17  ;;  %v2767_v19 = vpop.eup %2766  ;;  %v1593_v17 = vld [vmem:[%s3494_s9] sm:$0xff] }
 0x3b8   : > { %v1346_v21 = vmul.f32 0.6931472, %v2767_v19 }
 0x3b9   : > { %v1347_v20 = vsub.f32 0.0, %v1344_v18  ;;  %v1597_v18 = vld [vmem:[%s3494_s9 + $0x20] sm:$0xff] }
 0x3ba   : > { %1325 = vadd.xlane.f32.xlu1 %v1324_v7  ;;  %v1348_v22 = vsub.f32 0.0, %v1346_v21  ;;  %v2753_v7 = vld [vmem:[%s3492_s7 + $0x8] sm:$0xff]   ;;  %v2377_v19 = vcombine.low %v1593_v17, %v1597_v18 }
 0x3bb   : > { %2768 = vlog2.f32 %v1347_v20  ;;  %v2378_v20 = vcombine.high %v1593_v17, %v1597_v18 }
 0x3bc   : > { %2770 = vlog2.f32 %v1348_v22 }
 0x3c5   : > { %v2769_v25 = vpop.eup %2768 }
 0x3c6   : > { %v1350_v26 = vmul.f32 0.6931472, %v2769_v25  ;;  %v2771_v27 = vpop.eup %2770 }
 0x3c7   : > { %v1352_v32 = vmul.f32 0.6931472, %v2771_v27 }
 0x3c8   : > { %v1353_v31 = vsub.f32 0.0, %v1350_v26 }
 0x3c9   : > { %v1354_v38 = vsub.f32 0.0, %v1352_v32  ;;  %v1601_v32 = vld [vmem:[%s3494_s9 + $0x40] sm:$0xff] }
 0x443   : > { %v1323_v23 = vpop.xlane.xlu1 %1322 }
 0x444   : > { %2772 = vrcp.f32 %v1323_v23 }
 0x445   : > { %2774 = vlog2.f32 %v1323_v23 }
 0x447   : > { %v1326_v24 = vpop.xlane.xlu1 %1325 }
 0x448   : > { %2776 = vlog2.f32 %v1326_v24 }
 0x44e   : > { %v2773_v28 = vpop.eup %2772 }
 0x44f   : > { %v2775_v29 = vpop.eup %2774  ;;  %v1329_v34 = vmul.f32 %v2773_v28, %v2761_v4 }
 0x450   : > { %v1332_v30 = vmul.f32 0.6931472, %v2775_v29 }
 0x452   : > { %v1335_v33 = vsub.f32 %v1315_v63, %v1332_v30  ;;  %v2777_v35 = vpop.eup %2776 }
 0x453   : > { %v1334_v36 = vmul.f32 0.6931472, %v2777_v35  ;;  %v1598_v35 = vld [vmem:[%s3494_s9 + $0x28] sm:$0xff] }
 0x454   : > { %v1355_v37 = vadd.f32 %v1353_v31, %v1335_v33  ;;  %v1379_v40 = vmul.f32 %v1335_v33, %v1329_v34  ;;  %v1594_v34 = vld [vmem:[%s3494_s9 + $0x8] sm:$0xff] }
 0x455   : > { %v1336_v42 = vsub.f32 %v1316_v61, %v1334_v36  ;;  %v1221_v61 = vand.u32 7, %v2939_v13  ;;  %v2752_v13 = vld [vmem:[%s3492_s7] sm:$0xff]   ;;  %v2379_v36 = vcombine.low %v1594_v34, %v1598_v35 }
 0x456   : > { %v1357_v41 = vsel %vm1308_vm4, %v1355_v37, -inf  ;;  %v1381_v58 = vsel %vm1308_vm4, %v1379_v40, 0.0 }
 0x457   : > { %1358 = vmax.xlane.f32.xlu1 %v1357_v41  ;;  %v1356_v43 = vadd.f32 %v1354_v38, %v1336_v42  ;;  %vm1222_vm5 = vcmp.eq.s32.totalorder %v1221_v61, %v2941_v14  ;;  %v1502_v38 = vld [vmem:[%s3493_s8] sm:$0x1] }
 0x458   : > { %2615 = vmatprep.subr.msk.mxu0 %vm1222_vm5, %v2832_v62 }
 0x459   : > { %v1360_v44 = vsel %vm1308_vm4, %v1356_v43, -inf  ;;  %2616 = vmatpush3.msk.msra.mxu0 %vm1222_vm5, %v2832_v62 }
 0x45a   : > { %2620 = vmatprep.subr.bf16.mxu0 %v2828_v0 }
 0x45b   : > { %1361 = vmax.xlane.f32.xlu1 %v1360_v44  ;;  %v1602_v44 = vld [vmem:[%s3494_s9 + $0x48] sm:$0xff] }
 0x4e4   : > { %v1359_v45 = vpop.xlane.xlu1 %1358 }
 0x4e5   : > { %v1363_v46 = vsub.f32 %v1355_v37, %v1359_v45  ;;  %v2380_v37 = vcombine.high %v1594_v34, %v1598_v35  ;;  %v1606_v45 = vld [vmem:[%s3494_s9 + $0x68] sm:$0xff]  ;;  %v1713_v35 = vsub.s32 5, %v2941_v14 }
 0x4e7   : > { %v1365_v15 = vmul.f32 1.442695, %v1363_v46 }
 0x4e8   : > { %v1362_v47 = vpop.xlane.xlu1 %1361 }
 0x4e9   : > { %2778 = vpow2.f32 %v1365_v15  ;;  %v1364_v48 = vsub.f32 %v1356_v43, %v1362_v47 }
 0x4ea   : > { %2780 = vrcp.f32 %v1326_v24 }
 0x4eb   : > { %v1367_v50 = vmul.f32 1.442695, %v1364_v48  ;;  %v2388_v48 = vcombine.high %v1602_v44, %v1606_v45 }
 0x4ed   : > { %2782 = vpow2.f32 %v1367_v50  ;;  %v1595_v50 = vld [vmem:[%s3494_s9 + $0x10] sm:$0xff] }
 0x4f3   : > { %v2779_v52 = vpop.eup %2778 }
 0x4f4   : > { %v1369_v53 = vsel %vm1308_vm4, %v2779_v52, 0.0  ;;  %v2781_v54 = vpop.eup %2780 }
 0x4f5   : > { %1370 = vadd.xlane.f32.xlu1 %v1369_v53  ;;  %v1330_v57 = vmul.f32 %v2781_v54, %v3244_v6  ;;  %v2387_v53 = vcombine.low %v1602_v44, %v1606_v45 }
 0x4f7   : > { %v2783_v55 = vpop.eup %2782  ;;  %v1380_v59 = vmul.f32 %v1336_v42, %v1330_v57 }
 0x4f8   : > { %v1372_v56 = vsel %vm1308_vm4, %v2783_v55, 0.0 }
 0x4f9   : > { %1373 = vadd.xlane.f32.xlu1 %v1372_v56  ;;  %v1384_v60 = vsel %vm1308_vm4, %v1380_v59, 0.0  ;;  %v1607_v56 = vld [vmem:[%s3494_s9 + $0x70] sm:$0xff]  ;;  %v1596_v59 = vld [vmem:[%s3494_s9 + $0x18] sm:$0xff] }
 0x4fd   : > { %1382 = vadd.xlane.f32.xlu1 %v1381_v58 }
 0x501   : > { %1385 = vadd.xlane.f32.xlu1 %v1384_v60  ;;  %v1600_v60 = vld [vmem:[%s3494_s9 + $0x38] sm:$0xff] }
 0x502   : > { %v2384_v62 = vcombine.high %v1596_v59, %v1600_v60 }
 0x582   : > { %v1371_v63 = vpop.xlane.xlu1 %1370 }
 0x583   : > { %2784 = vrcp.f32 %v1371_v63  ;;  %v1604_v63 = vld [vmem:[%s3494_s9 + $0x58] sm:$0xff] }
 0x586   : > { %v1374_v1 = vpop.xlane.xlu1 %1373 }
 0x587   : > { %2786 = vrcp.f32 %v1374_v1  ;;  %v1608_v1 = vld [vmem:[%s3494_s9 + $0x78] sm:$0xff] }
 0x58d   : > { %v2785_v2 = vpop.eup %2784 }
 0x58e   : > { %v1377_v4 = vmul.f32 %v2785_v2, %v2779_v52  ;;  %v1599_v52 = vld [vmem:[%s3494_s9 + $0x30] sm:$0xff]  ;;  %v2383_v2 = vcombine.low %v1596_v59, %v1600_v60 }
 0x58f   : > { %v2382_v54 = vcombine.high %v1595_v50, %v1599_v52  ;;  %v2381_v57 = vcombine.low %v1595_v50, %v1599_v52 }
 0x590   : > { %2617 = vmatprep.mubr.msk.f32.mxu0 %vm1308_vm4, %v1377_v4  ;;  %v2392_v4 = vcombine.high %v1604_v63, %v1608_v1 }
 0x591   : > { %v2787_v5 = vpop.eup %2786 }
 0x592   : > { %v1378_v6 = vmul.f32 %v2787_v5, %v2783_v55  ;;  %v1603_v55 = vld [vmem:[%s3494_s9 + $0x50] sm:$0xff]  ;;  %v2391_v5 = vcombine.low %v1604_v63, %v1608_v1 }
 0x593   : > { %v2390_v58 = vcombine.high %v1603_v55, %v1607_v56  ;;  %v2389_v61 = vcombine.low %v1603_v55, %v1607_v56 }
 0x594   : > { %2618 = vmatmul.mubr.msk.f32.vlgmr.msra.gmra.mrb[6].mxu0 %vm1308_vm4, %v1378_v6  ;;  %v1697_v6 = vsub.s32 1, %v2941_v14 }
 0x595   : > { %2621 = vmatpush3.bf16.msra.mxu0 %v2752_v13  ;;  %2636 = vmatprep.mubr.msk.bf16.mxu0 %vm2829_vm0, %v2828_v0  ;;  %vm1731_vm0 = vcmask 261120   ;;  %v3361_v13 = vld [vmem:[%s3495_s10] sm:$0xff] }
 0x596   : > { %2622 = vmatprep.subr.bf16.mxu0 %v2828_v0 }
 0x599   : > { %2623 = vmatpush3.bf16.msra.mxu0 %v2753_v7  ;;  %v1694_v7 = vrot.slane %v3361_v13, %v3230_v39 }
 0x59a   : > { %2624 = vmatprep.subr.bf16.mxu0 %v2828_v0 }
 0x59d   : > { %2625 = vmatpush3.bf16.msra.mxu0 %v2754_v8  ;;  %v1698_v8 = vrot.slane %v3361_v13, %v1697_v6 }
 0x59e   : > { %2626 = vmatprep.subr.bf16.mxu0 %v2828_v0 }
 0x5a1   : > { %2627 = vmatpush3.bf16.msra.mxu0 %v2755_v9 }
 0x5a2   : > { %2628 = vmatprep.subr.bf16.mxu0 %v2828_v0 }
 0x5a5   : > { %2629 = vmatpush3.bf16.msra.mxu0 %v2756_v10 }
 0x5a6   : > { %2630 = vmatprep.subr.bf16.mxu0 %v2828_v0 }
 0x5a9   : > { %2631 = vmatpush3.bf16.msra.mxu0 %v2757_v11  ;;  %v1701_v11 = vsub.s32 2, %v2941_v14 }
 0x5aa   : > { %2632 = vmatprep.subr.bf16.mxu0 %v2828_v0 }
 0x5ad   : > { %2633 = vmatpush3.bf16.msra.mxu0 %v2758_v12 }
 0x5ae   : > { %2634 = vmatprep.subr.bf16.mxu0 %v2828_v0 }
 0x5b1   : > { %2635 = vmatpush3.bf16.msra.mxu0 %v2759_v16  ;;  %v2833_v16 = vmov 1966171168  }
 0x5b2   : > { %1735 = vmatprep.subr.bf16.mxu0 %v2378_v20  ;;  %v1985_v17 = vunpack.c.l.s4 %v2833_v16 }
 0x667   : > { %v2619_v21 = vpop.f32.mrb[6].mxu0 }
 0x668   : > { %v1477_v22 = vmul.f32 %v2619_v21, %v3233_v49  ;;  %v1467_v0 = vpop.f32.mrb[7].mxu0  ;;  %v1605_v49 = vld [vmem:[%s3494_s9 + $0x60] sm:$0xff] }
 0x669   : > { %v1476_v23 = vmul.f32 %v3236_v51, %v1467_v0  ;;  %v2386_v51 = vcombine.high %v1601_v32, %v1605_v49  ;;  %v2385_v33 = vcombine.low %v1601_v32, %v1605_v49  ;;  %v1709_v49 = vsub.s32 4, %v2941_v14 }
 0x66b   : > { %v1478_v24 = vadd.f32 %v1477_v22, %v1476_v23 }
 0x66d   : > { %v1479_v25 = vrot.slane %v1478_v24, 4 }
 0x66f   : > { %v1480_v26 = vadd.f32 %v1479_v25, %v1478_v24  ;;  %v1702_v24 = vrot.slane %v3361_v13, %v1701_v11 }
 0x671   : > { %v1481_v27 = vrot.slane %v1480_v26, 2 }
 0x673   : > { %v1482_v28 = vadd.f32 %v1481_v27, %v1480_v26  ;;  %v1986_v26 = vunpack.c.0.s8 %v1985_v17 }
 0x675   : > { %v1483_v29 = vrot.slane %v1482_v28, 1 }
 0x677   : > { %v1484_v30 = vadd.f32 %v1483_v29, %v1482_v28 }
 0x679   : > { %v1485_v31 = vpack.c.bf16 %v1484_v30, %v1484_v30 }
 0x67b   : > { %2637 = vmatmul.mubr.bf16.vlgmr.msra.gmra.mrb[8].mxu0 %v1485_v31 }
 0x67c   : > { %1736 = vmatpush1.bf16.msra.mxu0 %v2377_v19  ;;  %1767 = vmatprep.mubr.bf16.mxu0 %v2830_v3  ;;  %v1705_v19 = vsub.s32 3, %v2941_v14 }
 0x67d   : > { %1737 = vmatprep.subr.bf16.mxu0 %v2386_v51  ;;  %v3389_v51 = vsub.s32 %v1986_v26, %v2941_v14 }
 0x67e   : > { %v1706_v27 = vrot.slane %v3361_v13, %v1705_v19 }
 0x680   : > { %1738 = vmatpush1.bf16.msra.mxu0 %v2385_v33 }
 0x681   : > { %1776 = vmatprep.subr.bf16.mxu0 %v2380_v37 }
 0x74e   : > { %v1585_v40 = vpop.f32.mrb[8].mxu0 }
 0x74f   : > { %v1586_v41 = vadd.f32 %v1585_v40, %v1502_v38  ;;  %v2638_v42 = vpop.f32.mrb[9].mxu0 }
 0x750   : > { %v1588_v43 = vpop.f32.mrb[10].mxu0  ;;  %v1710_v42 = vrot.slane %v3361_v13, %v1709_v49 }
 0x751   : > { %v1591_v46 = vmax.f32 %v1586_v41, 0.0  ;;  %v2639_v15 = vpop.f32.mrb[11].mxu0 }
 0x753   : > { %v1592_v47 = vpack.c.bf16 %v1591_v46, %v1591_v46  ;;  %v1714_v46 = vrot.slane %v3361_v13, %v1713_v35 }
 0x755   : > { %2393 = vmatmul.mubr.msk.bf16.vlgmr.msra.gmra.mrb[12].mxu0 %vm1731_vm0, %v1592_v47 }
 0x756   : > { %1777 = vmatpush1.bf16.msra.mxu0 %v2379_v36  ;;  %1808 = vmatprep.mubr.bf16.mxu0 %v2830_v3 }
 0x757   : > { %1778 = vmatprep.subr.bf16.mxu0 %v2388_v48 }
 0x75a   : > { %1779 = vmatpush1.bf16.msra.mxu0 %v2387_v53 }
 0x75b   : > { %1817 = vmatprep.subr.bf16.mxu0 %v2382_v54  ;;  %v1717_v54 = vsub.s32 6, %v2941_v14 }
 0x75d   : > { %2394 = vmatmul.mubr.msk.bf16.vlgmr.msra.gmra.mrb[16].mxu0 %vm1731_vm0, %v1592_v47 }
 0x75e   : > { %1818 = vmatpush1.bf16.msra.mxu0 %v2381_v57  ;;  %1849 = vmatprep.mubr.bf16.mxu0 %v2830_v3  ;;  %v1721_v57 = vsub.s32 7, %v2941_v14 }
 0x75f   : > { %1819 = vmatprep.subr.bf16.mxu0 %v2390_v58 }
 0x762   : > { %1820 = vmatpush1.bf16.msra.mxu0 %v2389_v61 }
 0x763   : > { %1858 = vmatprep.subr.bf16.mxu0 %v2384_v62 }
 0x765   : > { %2395 = vmatmul.mubr.msk.bf16.vlgmr.msra.gmra.mrb[20].mxu0 %vm1731_vm0, %v1592_v47 }
 0x766   : > { %1859 = vmatpush1.bf16.msra.mxu0 %v2383_v2  ;;  %1890 = vmatprep.mubr.bf16.mxu0 %v2830_v3 }
 0x767   : > { %1860 = vmatprep.subr.bf16.mxu0 %v2392_v4 }
 0x76a   : > { %1861 = vmatpush1.bf16.msra.mxu0 %v2391_v5  ;;  %v1718_v5 = vrot.slane %v3361_v13, %v1717_v54 }
 0x76d   : > { %2396 = vmatmul.mubr.msk.bf16.vlgmr.msra.gmra.mrb[24].mxu0 %vm1731_vm0, %v1592_v47 }
 0x828   : > { %v1769_v9 = vpop.f32.mrb[12].mxu0 }
 0x829   : > { %v3369_v3 = vadd.f32 %v1769_v9, %v1694_v7  ;;  %v1771_v10 = vpop.f32.mrb[13].mxu0 }
 0x82a   : > { %v3372_v12 = vadd.f32 %v1771_v10, %v1698_v8  ;;  %v1773_v18 = vpop.f32.mrb[14].mxu0  ;;  %v1722_v8 = vrot.slane %v3361_v13, %v1721_v57 }
 0x82b   : > { %v1908_v20 = vand.u32 2147483647, %v3369_v3  ;;  %v1774_v21 = vpop.f32.mrb[15].mxu0 }
 0x82c   : > { %v1909_v22 = vand.u32 2147483647, %v3372_v12  ;;  %v1980_v0 = vcombine.low %v3369_v3, %v3372_v12 }
 0x82d   : > { %v1916_v23 = vsub.f32 0.0, %v1908_v20 }
 0x82e   : > { %v1917_v25 = vsub.f32 0.0, %v1909_v22  ;;  %v3402_v43 = vrot.slane %v1980_v0, %v3389_v51 }
 0x82f   : > { %v1924_v28 = vmul.f32 1.442695, %v1916_v23 }
 0x830   : > { %v1926_v29 = vmul.f32 1.442695, %v1917_v25  ;;  %v1810_v30 = vpop.f32.mrb[16].mxu0 }
 0x831   : > { %2788 = vpow2.f32 %v1924_v28  ;;  %v3385_v31 = vadd.f32 %v1810_v30, %v1702_v24  ;;  %v1812_v32 = vpop.f32.mrb[17].mxu0 }
 0x832   : > { %2790 = vpow2.f32 %v1926_v29  ;;  %v3391_v33 = vadd.f32 %v1812_v32, %v1706_v27  ;;  %v1814_v34 = vpop.f32.mrb[18].mxu0 }
 0x833   : > { %v1910_v36 = vand.u32 2147483647, %v3385_v31  ;;  %v1815_v37 = vpop.f32.mrb[19].mxu0 }
 0x834   : > { %v1911_v38 = vand.u32 2147483647, %v3391_v33  ;;  %v1981_v40 = vcombine.low %v3385_v31, %v3391_v33 }
 0x835   : > { %v1918_v41 = vsub.f32 0.0, %v1910_v36 }
 0x836   : > { %v1919_v44 = vsub.f32 0.0, %v1911_v38  ;;  %v1997_v45 = vrot.slane %v1981_v40, %v3389_v51 }
 0x837   : > { %v1928_v15 = vmul.f32 1.442695, %v1918_v41  ;;  %v1900_v41 = vmax.f32 %v3369_v3, 0.0 }
 0x838   : > { %v1930_v47 = vmul.f32 1.442695, %v1919_v44  ;;  %v2012_v48 = vcombine.low %v3402_v43, %v1997_v45  ;;  %v1851_v50 = vpop.f32.mrb[20].mxu0  ;;  %v1901_v43 = vmax.f32 %v3372_v12, 0.0  ;;  %v1902_v12 = vmax.f32 %v3385_v31, 0.0 }
 0x839   : > { %2792 = vpow2.f32 %v1928_v15  ;;  %v3409_v52 = vadd.f32 %v1851_v50, %v1710_v42  ;;  %v1853_v53 = vpop.f32.mrb[21].mxu0 }
 0x83a   : > { %2794 = vpow2.f32 %v1930_v47  ;;  %v3412_v55 = vadd.f32 %v1853_v53, %v1714_v46  ;;  %v1855_v56 = vpop.f32.mrb[22].mxu0  ;;  %v2020_v45 = vrot.slane %v2012_v48, %v3389_v51  ;;  %v1903_v48 = vmax.f32 %v3391_v33, 0.0 }
 0x83b   : > { %v2789_v58 = vpop.eup %2788  ;;  %v1912_v59 = vand.u32 2147483647, %v3409_v52  ;;  %v1856_v60 = vpop.f32.mrb[23].mxu0  ;;  %v1904_v31 = vmax.f32 %v3409_v52, 0.0 }
 0x83c   : > { %v2791_v61 = vpop.eup %2790  ;;  %v1940_v62 = vadd.f32 1.0, %v2789_v58  ;;  %v1913_v63 = vand.u32 2147483647, %v3412_v55  ;;  %v1982_v1 = vcombine.low %v3409_v52, %v3412_v55 }
 0x83d   : > { %v1941_v2 = vadd.f32 1.0, %v2791_v61  ;;  %v1920_v4 = vsub.f32 0.0, %v1912_v59 }
 0x83e   : > { %2796 = vlog2.f32 %v1940_v62  ;;  %v1921_v7 = vsub.f32 0.0, %v1913_v63  ;;  %v2004_v29 = vrot.slane %v1982_v1, %v3389_v51 }
 0x83f   : > { %2798 = vlog2.f32 %v1941_v2  ;;  %v1932_v9 = vmul.f32 1.442695, %v1920_v4 }
 0x840   : > { %v1934_v10 = vmul.f32 1.442695, %v1921_v7  ;;  %v1892_v16 = vpop.f32.mrb[24].mxu0 }
 0x841   : > { %2800 = vpow2.f32 %v1932_v9  ;;  %v3425_v17 = vadd.f32 %v1892_v16, %v1718_v5  ;;  %v1894_v18 = vpop.f32.mrb[25].mxu0 }
 0x842   : > { %2802 = vpow2.f32 %v1934_v10  ;;  %v3427_v20 = vadd.f32 %v1894_v18, %v1722_v8  ;;  %v1896_v21 = vpop.f32.mrb[26].mxu0 }
 0x843   : > { %v2793_v22 = vpop.eup %2792  ;;  %v1914_v0 = vand.u32 2147483647, %v3425_v17  ;;  %v1897_v23 = vpop.f32.mrb[27].mxu0 }
 0x844   : > { %v2795_v24 = vpop.eup %2794  ;;  %v1942_v25 = vadd.f32 1.0, %v2793_v22  ;;  %v1915_v13 = vand.u32 2147483647, %v3427_v20  ;;  %v1983_v26 = vcombine.low %v3425_v17, %v3427_v20 }
 0x845   : > { %v1943_v27 = vadd.f32 1.0, %v2795_v24  ;;  %v1922_v28 = vsub.f32 0.0, %v1914_v0  ;;  %v1905_v0 = vmax.f32 %v3412_v55, 0.0 }
 0x846   : > { %2804 = vlog2.f32 %v1942_v25  ;;  %v1923_v30 = vsub.f32 0.0, %v1915_v13  ;;  %v2011_v32 = vrot.slane %v1983_v26, %v3389_v51 }
 0x847   : > { %2806 = vlog2.f32 %v1943_v27  ;;  %v1936_v34 = vmul.f32 1.442695, %v1922_v28  ;;  %v1906_v28 = vmax.f32 %v3425_v17, 0.0 }
 0x848   : > { %v2797_v36 = vpop.eup %2796  ;;  %v1938_v37 = vmul.f32 1.442695, %v1923_v30  ;;  %v2013_v38 = vcombine.low %v2004_v29, %v2011_v32  ;;  %v1907_v30 = vmax.f32 %v3427_v20, 0.0 }
 0x849   : > { %v2799_v40 = vpop.eup %2798  ;;  %v1949_v42 = vmul.f32 0.6931472, %v2797_v36  ;;  %2808 = vpow2.f32 %v1936_v34 }
 0x84a   : > { %v1951_v44 = vmul.f32 0.6931472, %v2799_v40  ;;  %2810 = vpow2.f32 %v1938_v37  ;;  %v2027_v46 = vrot.slane %v2013_v38, %v3389_v51  ;;  %v1899_v40 = vld [vmem:[%s411_s14] sm:$0xff] }
 0x84b   : > { %v2801_v15 = vpop.eup %2800  ;;  %v1964_v47 = vadd.f32 %v1949_v42, %v1900_v41 }
 0x84c   : > { %v2803_v50 = vpop.eup %2802  ;;  %v1965_v53 = vadd.f32 %v1951_v44, %v1901_v43  ;;  %v1944_v56 = vadd.f32 1.0, %v2801_v15  ;;  %v2028_v58 = vcombine.low %v2020_v45, %v2027_v46 }
 0x84d   : > { %v1945_v59 = vadd.f32 1.0, %v2803_v50 }
 0x84e   : > { %v2039_v60 = vcombine.low %v1964_v47, %v1965_v53  ;;  %2812 = vlog2.f32 %v1944_v56  ;;  %v2030_v20 = vmul.f32 %v2028_v58, %v1899_v40 }
 0x84f   : > { %2814 = vlog2.f32 %v1945_v59 }
 0x850   : > { %v2805_v3 = vpop.eup %2804  ;;  %v2049_v16 = vrot.slane %v2039_v60, %v3389_v51 }
 0x851   : > { %v2807_v61 = vpop.eup %2806  ;;  %v1953_v62 = vmul.f32 0.6931472, %v2805_v3 }
 0x852   : > { %v1955_v63 = vmul.f32 0.6931472, %v2807_v61 }
 0x853   : > { %v2809_v1 = vpop.eup %2808  ;;  %v1966_v2 = vadd.f32 %v1953_v62, %v1902_v12 }
 0x854   : > { %v2811_v4 = vpop.eup %2810  ;;  %v1967_v5 = vadd.f32 %v1955_v63, %v1903_v48  ;;  %v1946_v7 = vadd.f32 1.0, %v2809_v1  ;;  %v1383_v63 = vpop.xlane.xlu1 %1382 }
 0x855   : > { %v1947_v8 = vadd.f32 1.0, %v2811_v4 }
 0x856   : > { %v2040_v9 = vcombine.low %v1966_v2, %v1967_v5  ;;  %2816 = vlog2.f32 %v1946_v7 }
 0x857   : > { %2818 = vlog2.f32 %v1947_v8 }
 0x858   : > { %v2813_v10 = vpop.eup %2812  ;;  %v2056_v18 = vrot.slane %v2040_v9, %v3389_v51  ;;  %v1386_v1 = vpop.xlane.xlu1 %1385 }
 0x859   : > { %v2815_v21 = vpop.eup %2814  ;;  %v1957_v33 = vmul.f32 0.6931472, %v2813_v10 }
 0x85a   : > { %v2071_v22 = vcombine.low %v2049_v16, %v2056_v18  ;;  %v1959_v23 = vmul.f32 0.6931472, %v2815_v21 }
 0x85b   : > { %v1968_v24 = vadd.f32 %v1957_v33, %v1904_v31 }
 0x85c   : > { %v1969_v25 = vadd.f32 %v1959_v23, %v1905_v0  ;;  %v2079_v17 = vrot.slane %v2071_v22, %v3389_v51 }
 0x85e   : > { %v2041_v13 = vcombine.low %v1968_v24, %v1969_v25 }
 0x860   : > { %v2817_v26 = vpop.eup %2816  ;;  %v2063_v37 = vrot.slane %v2041_v13, %v3389_v51 }
 0x861   : > { %v2819_v27 = vpop.eup %2818  ;;  %v1961_v29 = vmul.f32 0.6931472, %v2817_v26 }
 0x862   : > { %v1963_v32 = vmul.f32 0.6931472, %v2819_v27 }
 0x863   : > { %v1970_v34 = vadd.f32 %v1961_v29, %v1906_v28 }
 0x864   : > { %v1971_v36 = vadd.f32 %v1963_v32, %v1907_v30 }
 0x866   : > { %v2042_v52 = vcombine.low %v1970_v34, %v1971_v36 }
 0x868   : > { %v2070_v55 = vrot.slane %v2042_v52, %v3389_v51 }
 0x86a   : > { %v2072_v38 = vcombine.low %v2063_v37, %v2070_v55 }
 0x86c   : > { %v2086_v41 = vrot.slane %v2072_v38, %v3389_v51 }
 0x86e   : > { %v2087_v42 = vcombine.low %v2079_v17, %v2086_v41 }
 0x870   : > { %v2089_v43 = vsub.f32 %v2030_v20, %v2087_v42 }
 0x872   : > { %v2094_v44 = vrot.slane %v2089_v43, %v3230_v39  ;;  %v2098_v45 = vrot.slane %v2089_v43, %v1697_v6  ;;  %v2102_v46 = vrot.slane %v2089_v43, %v1701_v11  ;;  %v2106_v15 = vrot.slane %v2089_v43, %v1705_v19 }
 0x873   : > { %v2110_v53 = vrot.slane %v2089_v43, %v1709_v49  ;;  %v2114_v6 = vrot.slane %v2089_v43, %v1713_v35  ;;  %v2118_v19 = vrot.slane %v2089_v43, %v1717_v54  ;;  %v2122_v3 = vrot.slane %v2089_v43, %v1721_v57 }
 0x874   : > { %v2132_v47 = vsel %vm2131_vm6, %v2094_v44, 0.0  ;;  %v2133_v50 = vsel %vm2131_vm6, %v2098_v45, 0.0  ;;  %v2135_v56 = vsel %vm2131_vm6, %v2102_v46, 0.0  ;;  %v2137_v58 = vsel %vm2131_vm6, %v2106_v15, 0.0 }
 0x875   : > { %v2134_v51 = vadd.f32 %v2133_v50, %v2132_v47  ;;  %v2139_v59 = vsel %vm2131_vm6, %v2110_v53, 0.0  ;;  %v2141_v49 = vsel %vm2131_vm6, %v2114_v6, 0.0  ;;  %v2143_v12 = vsel %vm2131_vm6, %v2118_v19, 0.0 }
 0x876   : > { %v2145_v35 = vsel %vm2131_vm6, %v2122_v3, 0.0  ;;  %v1387_v54 = vadd.f32 %v1386_v1, %v1383_v63 }
 0x877   : > { %v2136_v39 = vadd.f32 %v2135_v56, %v2134_v51 }
 0x878   : > { %v1388_v2 = vrot.slane %v1387_v54, 4 }
 0x879   : > { %v2138_v11 = vadd.f32 %v2137_v58, %v2136_v39 }
 0x87a   : > { %v1389_v4 = vadd.f32 %v1388_v2, %v1387_v54 }
 0x87b   : > { %v2140_v60 = vadd.f32 %v2139_v59, %v2138_v11 }
 0x87c   : > { %v1390_v5 = vrot.slane %v1389_v4, 2 }
 0x87d   : > { %v2142_v61 = vadd.f32 %v2141_v49, %v2140_v60 }
 0x87e   : > { %v1391_v7 = vadd.f32 %v1390_v5, %v1389_v4 }
 0x87f   : > { %v2144_v62 = vadd.f32 %v2143_v12, %v2142_v61 }
 0x880   : > { %v1392_v14 = vrot.slane %v1391_v7, 1 }
 0x881   : > { %v2146_v48 = vadd.f32 %v2145_v35, %v2144_v62 }
 0x882   : > { %v1393_v57 = vadd.f32 %v1392_v14, %v1391_v7 }
 0x883   : > { %2147 = vadd.xlane.f32.xlu0 %v2146_v48 }
 0x884   : > { %v1394_v8 = vadd.f32 33.271065, %v1393_v57 }
 0x910   : > { %v2148_v9 = vpop.xlane.xlu0 %2147 }
 0x911   : > { %v2149_v10 = vsub.f32 %v2148_v9, %v1394_v8 }
 0x913   : > { %2150 = vst [vmem:[%s419_s19] sm:$0x1] %v2149_v10 }
 0x914 PF: > { %s21_s17 = sadd.s32 1, %s2826_s17  }
 0x915   : > { %p18_p4 = scmp.ge.s32.totalorder %s21_s17, 4  }
 0x917   :  { %20 = sbr.rel (!%p18_p4) target bundleno = 1 (0x1), region = 107 }

</bundles_post_ra>
